<compile_context>
chip_gen: v7x
topology: tpu7x:2x2x1
jax: 0.10.0
libtpu: 0.0.40
codegen_flags: <defaults>
</compile_context>

<pallas_src>
import math

import jax
import jax.numpy as jnp
from jax import lax
from jax.experimental import pallas as pl
from jax.experimental.pallas import tpu as pltpu

# ------------------------- small synthetic BERT config ----------------------
B, S, H = 2, 16, 128          # batch, seq_len, hidden_size
NH, HD = 4, 32                # num_attention_heads, head_dim (NH * HD == H)
I = 512                       # intermediate_size (4 * H)
VOCAB = 64                    # vocab_size (synthetic)
NLAYERS = 2                   # num_hidden_layers (synthetic)
LN_EPS = 1e-12                # BERT layer_norm_eps
CLS_ID, SEP_ID = 1, 2

# TODO(synk): tokenizer.batch_encode_plus, MLM random token corruption and the
# ragged word/noun-phrase "grounded" pooling are host-side Python (strings /
# np.random / ragged lengths) with no TPU-kernel equivalent; the kernel takes
# token ids + attention mask and returns the passthrough
# (word_and_noun_phrase_tokens == False) grounded outputs.


def _layernorm(v, g, b):
    mu = jnp.mean(v, axis=-1, keepdims=True)
    var = jnp.mean(jnp.square(v - mu), axis=-1, keepdims=True)
    return (v - mu) * lax.rsqrt(var + LN_EPS) * g + b


def _gelu(x):
    # TODO(synk): HF BERT uses the erf-based GELU; tanh approximation used for
    # guaranteed Mosaic lowering (difference is O(1e-3)).
    c = math.sqrt(2.0 / math.pi)
    return 0.5 * x * (1.0 + jnp.tanh(c * (x + 0.044715 * x * x * x)))


# ------------------------------ Pallas kernel --------------------------------
# grid = (B, NLAYERS); axis 0 'parallel' (megacore on v7x), axis 1 'arbitrary'
# (carried hidden state).  One grid step = one encoder layer on one sequence.
def bert_layer_kernel(
    emb_ref, bias_ref, eg_ref, eb_ref,
    wqkv_ref, bqkv_ref, wo_ref, bo_ref, ln1g_ref, ln1b_ref,
    w1_ref, b1_ref, w2_ref, b2_ref, ln2g_ref, ln2b_ref,
    o_ref,
):
    l = pl.program_id(1)

    # Fused embedding LayerNorm, written into the VMEM-resident carry block.
    @pl.when(l == 0)
    def _():
        o_ref[...] = _layernorm(emb_ref[...], eg_ref[...], eb_ref[...])

    x = o_ref[...]                                   # (S, H) f32 carry
    bias = bias_ref[...]                             # (S, S) additive key mask
    scale = 1.0 / math.sqrt(HD)

    # ---- fused QKV projection: one lane-dense (S,H)@(H,3H) bf16 matmul ------
    qkv = jnp.dot(x.astype(jnp.bfloat16), wqkv_ref[...],
                  preferred_element_type=jnp.float32) + bqkv_ref[...]  # (S, 3H)
    qkv_b = qkv.astype(jnp.bfloat16)

    # ---- per-head attention (NH=4 static; grid axis bounds live ranges) -----
    ctx = []
    for h in range(NH):
        qh = qkv_b[:, h * HD:(h + 1) * HD]                       # (S, HD)
        kh = qkv_b[:, H + h * HD:H + (h + 1) * HD]
        vh = qkv_b[:, 2 * H + h * HD:2 * H + (h + 1) * HD]
        s = lax.dot_general(qh, kh, (((1,), (1,)), ((), ())),
                            preferred_element_type=jnp.float32) * scale
        s = s + bias                                             # (S, S)
        m = jnp.max(s, axis=-1, keepdims=True)
        p = jnp.exp(s - m)
        p = p / jnp.sum(p, axis=-1, keepdims=True)               # exact divide
        ctx.append(jnp.dot(p.astype(jnp.bfloat16), vh,
                           preferred_element_type=jnp.float32))  # (S, HD)
    ctx = jnp.concatenate(ctx, axis=-1)                          # (S, H) lane-dense

    # ---- single (S,H)@(H,H) output projection --------------------------------
    attn = jnp.dot(ctx.astype(jnp.bfloat16), wo_ref[...],
                   preferred_element_type=jnp.float32) + bo_ref[...]
    h1 = _layernorm(x + attn, ln1g_ref[...], ln1b_ref[...])

    # ---- feed-forward ---------------------------------------------------------
    ff = _gelu(jnp.dot(h1.astype(jnp.bfloat16), w1_ref[...],
                       preferred_element_type=jnp.float32) + b1_ref[...])
    ff = jnp.dot(ff.astype(jnp.bfloat16), w2_ref[...],
                 preferred_element_type=jnp.float32) + b2_ref[...]
    o_ref[...] = _layernorm(h1 + ff, ln2g_ref[...], ln2b_ref[...])


_LAYER_WEIGHT_NAMES = ["wqkv", "bqkv", "wo", "bo", "ln1_g", "ln1_b",
                       "w1", "b1", "w2", "b2", "ln2_g", "ln2_b"]


def _layer_spec(w):
    nd = w.ndim
    # leading layer dim squeezed; index on it with the layer grid axis.
    return pl.BlockSpec((None,) + w.shape[1:],
                        lambda b, l, nd=nd: (l,) + (0,) * (nd - 1))


def _const_spec(shape):
    nd = len(shape)
    return pl.BlockSpec(shape, lambda b, l, nd=nd: (0,) * nd)


def bert_encoder(emb, attn_bias, params):
    weights = [params[n] for n in _LAYER_WEIGHT_NAMES]
    in_specs = [
        pl.BlockSpec((None, S, H), lambda b, l: (b, 0, 0)),   # embeddings
        pl.BlockSpec((None, S, S), lambda b, l: (b, 0, 0)),   # additive key mask
        _const_spec(params["emb_ln_g"].shape),
        _const_spec(params["emb_ln_b"].shape),
    ] + [_layer_spec(w) for w in weights]
    return pl.pallas_call(
        bert_layer_kernel,
        out_shape=jax.ShapeDtypeStruct((B, S, H), jnp.float32),
        grid=(B, NLAYERS),
        in_specs=in_specs,
        # constant block index across the layer axis -> VMEM-resident carry
        out_specs=pl.BlockSpec((None, S, H), lambda b, l: (b, 0, 0)),
        compiler_params=pltpu.CompilerParams(
            dimension_semantics=("parallel", "arbitrary")),
    )(emb, attn_bias, params["emb_ln_g"], params["emb_ln_b"], *weights)


# ------------------------------- full forward --------------------------------
def bert_forward(input_ids, attention_mask, special_tokens_mask, params):
    # Embedding gathers are glue (plain JAX); everything numeric afterwards
    # (embedding LayerNorm + all encoder layers) runs inside the Pallas call.
    word = params["word_emb"][input_ids]                       # (B, S, H)
    pos = params["pos_emb"][None, :, :]                        # (1, S, H)
    # single-segment inputs only (the module never passes token_type_ids, so
    # HF defaults them to zeros -> type_emb[0]).
    typ = params["type_emb"][0][None, None, :]                 # (1, 1, H)
    emb = word + pos + typ                                     # (B, S, H)

    # HF additive attention mask for padded keys, per sequence; cross-sequence
    # masking is structural (each batch element is its own grid block).
    mask_f = attention_mask.astype(jnp.float32)                # (B, S)
    attn_bias = jnp.broadcast_to(
        ((1.0 - mask_f) * (-10000.0))[:, None, :], (B, S, S))  # (B, S, S)

    encoded = bert_encoder(emb, attn_bias, params)             # (B, S, H)

    return dict(
        input_ids=input_ids,
        attention_mask=attention_mask,
        special_tokens_mask=special_tokens_mask,
        encoded_tokens=encoded,                    # bert_output[0]
        input_embeddings=word,                     # embeddings[input_ids]
        # word_and_noun_phrase_tokens == False -> passthrough branch
        grounded_input_embeddings=word,
        grounded_special_tokens_mask=special_tokens_mask,
        grounded_attention_mask=attention_mask,
    )


# ------------------------------ param construction ---------------------------
def init_params(key):
    def nrm(k, shape, scale=0.02):
        return scale * jax.random.normal(k, shape, dtype=jnp.float32)

    keys = jax.random.split(key, 3 + NLAYERS)
    params = {
        "word_emb": nrm(keys[0], (VOCAB, H)),
        "pos_emb": nrm(keys[1], (S, H)),
        "type_emb": nrm(keys[2], (2, H)),
        "emb_ln_g": jnp.ones((1, H), jnp.float32),
        "emb_ln_b": jnp.zeros((1, H), jnp.float32),
    }
    wqkv, wo, w1, w2 = [], [], [], []
    for l in range(NLAYERS):
        lk = jax.random.split(keys[3 + l], 6)
        # fused QKV weight, standard (K, N) layout -> one (H,3H) matmul/layer
        wqkv.append(jnp.concatenate(
            [nrm(lk[0], (H, H)), nrm(lk[1], (H, H)), nrm(lk[2], (H, H))],
            axis=1))
        wo.append(nrm(lk[3], (H, H)))
        w1.append(nrm(lk[4], (H, I)))
        w2.append(nrm(lk[5], (I, H)))
    params.update(
        wqkv=jnp.stack(wqkv).astype(jnp.bfloat16),            # (L, H, 3H)
        bqkv=jnp.zeros((NLAYERS, 1, 3 * H), jnp.float32),
        wo=jnp.stack(wo).astype(jnp.bfloat16),                # (L, H, H)
        bo=jnp.zeros((NLAYERS, 1, H), jnp.float32),
        ln1_g=jnp.ones((NLAYERS, 1, H), jnp.float32),
        ln1_b=jnp.zeros((NLAYERS, 1, H), jnp.float32),
        w1=jnp.stack(w1).astype(jnp.bfloat16),                # (L, H, I)
        b1=jnp.zeros((NLAYERS, 1, I), jnp.float32),
        w2=jnp.stack(w2).astype(jnp.bfloat16),                # (L, I, H)
        b2=jnp.zeros((NLAYERS, 1, H), jnp.float32),
        ln2_g=jnp.ones((NLAYERS, 1, H), jnp.float32),
        ln2_b=jnp.zeros((NLAYERS, 1, H), jnp.float32),
    )
    return params


if __name__ == "__main__":
    key = jax.random.PRNGKey(0)
    pkey, ikey = jax.random.split(key)
    params = init_params(pkey)

    # synthetic "tokenized" batch: ids in [3, VOCAB), [CLS]/[SEP] specials,
    # second sequence padded to length 12.
    lengths = jnp.array([S, 12], dtype=jnp.int32)
    positions = jnp.arange(S)[None, :]
    attention_mask = (positions < lengths[:, None]).astype(jnp.int32)     # (B, S)
    input_ids = jax.random.randint(ikey, (B, S), 3, VOCAB, dtype=jnp.int32)
    input_ids = jnp.where(positions == 0, CLS_ID, input_ids)
    input_ids = jnp.where(positions == lengths[:, None] - 1, SEP_ID, input_ids)
    input_ids = jnp.where(attention_mask == 0, 0, input_ids)              # [PAD]=0
    special_tokens_mask = (
        (positions == 0) | (positions == lengths[:, None] - 1) | (attention_mask == 0)
    ).astype(jnp.int32)

    out = bert_forward(input_ids, attention_mask, special_tokens_mask, params)
    jax.block_until_ready(out["encoded_tokens"])
    jax.block_until_ready(out["grounded_input_embeddings"])

    assert out["encoded_tokens"].shape == (B, S, H)
    assert out["input_embeddings"].shape == (B, S, H)
    assert bool(jnp.all(jnp.isfinite(out["encoded_tokens"])))
    print("KERNEL_OK")
</pallas_src>

<mosaic_0001>
module attributes {stable_mosaic.version = 11 : i64} {
  func.func @bert_layer_kernel(%arg0: i32, %arg1: i32, %arg2: memref<1x16x128xf32, #tpu.memory_space<vmem>>, %arg3: memref<1x16x16xf32, #tpu.memory_space<vmem>>, %arg4: memref<1x128xf32, #tpu.memory_space<vmem>>, %arg5: memref<1x128xf32, #tpu.memory_space<vmem>>, %arg6: memref<1x128x384xbf16, #tpu.memory_space<vmem>>, %arg7: memref<1x1x384xf32, #tpu.memory_space<vmem>>, %arg8: memref<1x128x128xbf16, #tpu.memory_space<vmem>>, %arg9: memref<1x1x128xf32, #tpu.memory_space<vmem>>, %arg10: memref<1x1x128xf32, #tpu.memory_space<vmem>>, %arg11: memref<1x1x128xf32, #tpu.memory_space<vmem>>, %arg12: memref<1x128x512xbf16, #tpu.memory_space<vmem>>, %arg13: memref<1x1x512xf32, #tpu.memory_space<vmem>>, %arg14: memref<1x512x128xbf16, #tpu.memory_space<vmem>>, %arg15: memref<1x1x128xf32, #tpu.memory_space<vmem>>, %arg16: memref<1x1x128xf32, #tpu.memory_space<vmem>>, %arg17: memref<1x1x128xf32, #tpu.memory_space<vmem>>, %arg18: memref<1x16x128xf32, #tpu.memory_space<vmem>>) attributes {dimension_semantics = [#tpu.dimension_semantics<parallel>, #tpu.dimension_semantics<arbitrary>], iteration_bounds = array<i64: 2, 2>, scalar_prefetch = 0 : i64, scratch_operands = 0 : i64, tpu.core_type = #tpu.core_type<tc>, window_params = [{transform_indices = @transform_0, window_bounds = array<i64: 1, 16, 128>}, {transform_indices = @transform_1, window_bounds = array<i64: 1, 16, 16>}, {pipeline_mode = #tpu.pipeline_mode<synchronous>, transform_indices = @transform_2, window_bounds = array<i64: 1, 128>}, {pipeline_mode = #tpu.pipeline_mode<synchronous>, transform_indices = @transform_3, window_bounds = array<i64: 1, 128>}, {transform_indices = @transform_4, window_bounds = array<i64: 1, 128, 384>}, {transform_indices = @transform_5, window_bounds = array<i64: 1, 1, 384>}, {transform_indices = @transform_6, window_bounds = array<i64: 1, 128, 128>}, {transform_indices = @transform_7, window_bounds = array<i64: 1, 1, 128>}, {transform_indices = @transform_8, window_bounds = array<i64: 1, 1, 128>}, {transform_indices = @transform_9, window_bounds = array<i64: 1, 1, 128>}, {transform_indices = @transform_10, window_bounds = array<i64: 1, 128, 512>}, {transform_indices = @transform_11, window_bounds = array<i64: 1, 1, 512>}, {transform_indices = @transform_12, window_bounds = array<i64: 1, 512, 128>}, {transform_indices = @transform_13, window_bounds = array<i64: 1, 1, 128>}, {transform_indices = @transform_14, window_bounds = array<i64: 1, 1, 128>}, {transform_indices = @transform_15, window_bounds = array<i64: 1, 1, 128>}, {transform_indices = @transform_16, window_bounds = array<i64: 1, 16, 128>}]} {
    %c0_i32 = arith.constant 0 : i32
    %0 = arith.cmpi eq, %arg1, %c0_i32 : i32
    %1 = arith.extui %0 : i1 to i32
    %c0_i32_0 = arith.constant 0 : i32
    %2 = arith.cmpi ne, %1, %c0_i32_0 : i32
    scf.if %2 {
      %c0_82 = arith.constant 0 : index
      %c0_83 = arith.constant 0 : index
      %c0_84 = arith.constant 0 : index
      %183 = vector.load %arg2[%c0_82, %c0_83, %c0_84] : memref<1x16x128xf32, #tpu.memory_space<vmem>>, vector<1x16x128xf32>
      %184 = vector.shape_cast %183 : vector<1x16x128xf32> to vector<16x128xf32>
      %c0_85 = arith.constant 0 : index
      %c0_86 = arith.constant 0 : index
      %185 = vector.load %arg4[%c0_85, %c0_86] : memref<1x128xf32, #tpu.memory_space<vmem>>, vector<1x128xf32>
      %c0_87 = arith.constant 0 : index
      %c0_88 = arith.constant 0 : index
      %186 = vector.load %arg5[%c0_87, %c0_88] : memref<1x128xf32, #tpu.memory_space<vmem>>, vector<1x128xf32>
      %cst_89 = arith.constant dense<0.000000e+00> : vector<16xf32>
      %187 = vector.multi_reduction <add>, %184, %cst_89 [1] : vector<16x128xf32> to vector<16xf32>
      %188 = vector.shape_cast %187 : vector<16xf32> to vector<16x1xf32>
      %cst_90 = arith.constant 1.280000e+02 : f32
      %189 = vector.broadcast %cst_90 : f32 to vector<16x1xf32>
      %190 = arith.divf %188, %189 : vector<16x1xf32>
      %191 = vector.broadcast %190 : vector<16x1xf32> to vector<16x128xf32>
      %192 = arith.subf %184, %191 : vector<16x128xf32>
      %193 = arith.mulf %192, %192 : vector<16x128xf32>
      %cst_91 = arith.constant dense<0.000000e+00> : vector<16xf32>
      %194 = vector.multi_reduction <add>, %193, %cst_91 [1] : vector<16x128xf32> to vector<16xf32>
      %195 = vector.shape_cast %194 : vector<16xf32> to vector<16x1xf32>
      %cst_92 = arith.constant 1.280000e+02 : f32
      %196 = vector.broadcast %cst_92 : f32 to vector<16x1xf32>
      %197 = arith.divf %195, %196 : vector<16x1xf32>
      %198 = vector.broadcast %190 : vector<16x1xf32> to vector<16x128xf32>
      %199 = arith.subf %184, %198 : vector<16x128xf32>
      %cst_93 = arith.constant 9.99999996E-13 : f32
      %200 = vector.broadcast %cst_93 : f32 to vector<16x1xf32>
      %201 = arith.addf %197, %200 : vector<16x1xf32>
      %202 = math.rsqrt %201 : vector<16x1xf32>
      %203 = vector.broadcast %202 : vector<16x1xf32> to vector<16x128xf32>
      %204 = arith.mulf %199, %203 : vector<16x128xf32>
      %205 = vector.broadcast %185 : vector<1x128xf32> to vector<16x128xf32>
      %206 = arith.mulf %204, %205 : vector<16x128xf32>
      %207 = vector.broadcast %186 : vector<1x128xf32> to vector<16x128xf32>
      %208 = arith.addf %206, %207 : vector<16x128xf32>
      %c0_94 = arith.constant 0 : index
      %c0_95 = arith.constant 0 : index
      %c0_96 = arith.constant 0 : index
      %209 = vector.load %arg18[%c0_94, %c0_95, %c0_96] : memref<1x16x128xf32, #tpu.memory_space<vmem>>, vector<1x16x128xf32>
      %210 = vector.shape_cast %209 : vector<1x16x128xf32> to vector<16x128xf32>
      %211 = vector.shape_cast %208 : vector<16x128xf32> to vector<1x16x128xf32>
      tpu.vector_store %arg18[%c0_94, %c0_95, %c0_96], %211 {strides = array<i32>} : memref<1x16x128xf32, #tpu.memory_space<vmem>>, vector<1x16x128xf32>,
    } else {
    }
    %c0 = arith.constant 0 : index
    %c0_1 = arith.constant 0 : index
    %c0_2 = arith.constant 0 : index
    %3 = vector.load %arg18[%c0, %c0_1, %c0_2] : memref<1x16x128xf32, #tpu.memory_space<vmem>>, vector<1x16x128xf32>
    %4 = vector.shape_cast %3 : vector<1x16x128xf32> to vector<16x128xf32>
    %c0_3 = arith.constant 0 : index
    %c0_4 = arith.constant 0 : index
    %c0_5 = arith.constant 0 : index
    %5 = vector.load %arg3[%c0_3, %c0_4, %c0_5] : memref<1x16x16xf32, #tpu.memory_space<vmem>>, vector<1x16x16xf32>
    %6 = vector.shape_cast %5 : vector<1x16x16xf32> to vector<16x16xf32>
    %7 = arith.truncf %4 : vector<16x128xf32> to vector<16x128xbf16>
    %c0_6 = arith.constant 0 : index
    %c0_7 = arith.constant 0 : index
    %c0_8 = arith.constant 0 : index
    %8 = vector.load %arg6[%c0_6, %c0_7, %c0_8] : memref<1x128x384xbf16, #tpu.memory_space<vmem>>, vector<1x128x384xbf16>
    %9 = vector.shape_cast %8 : vector<1x128x384xbf16> to vector<128x384xbf16>
    %cst = arith.constant dense<0.000000e+00> : vector<16x384xf32>
    %10 = tpu.matmul %7, %9, %cst {dimension_numbers = #tpu.dot_dimension_numbers<[1], [0], [0], [1], [0, 0, 1, 1], [], []>} : vector<16x128xbf16>, vector<128x384xbf16>, vector<16x384xf32> -> vector<16x384xf32>
    %c0_9 = arith.constant 0 : index
    %c0_10 = arith.constant 0 : index
    %c0_11 = arith.constant 0 : index
    %11 = vector.load %arg7[%c0_9, %c0_10, %c0_11] : memref<1x1x384xf32, #tpu.memory_space<vmem>>, vector<1x1x384xf32>
    %12 = vector.shape_cast %11 : vector<1x1x384xf32> to vector<1x384xf32>
    %13 = vector.broadcast %12 : vector<1x384xf32> to vector<16x384xf32>
    %14 = arith.addf %10, %13 : vector<16x384xf32>
    %15 = arith.truncf %14 : vector<16x384xf32> to vector<16x384xbf16>
    %16 = vector.extract_strided_slice %15 {offsets = [0, 0], sizes = [16, 32], strides = [1, 1]} : vector<16x384xbf16> to vector<16x32xbf16>
    %17 = vector.extract_strided_slice %15 {offsets = [0, 128], sizes = [16, 32], strides = [1, 1]} : vector<16x384xbf16> to vector<16x32xbf16>
    %18 = vector.extract_strided_slice %15 {offsets = [0, 256], sizes = [16, 32], strides = [1, 1]} : vector<16x384xbf16> to vector<16x32xbf16>
    %cst_12 = arith.constant dense<0.000000e+00> : vector<16x16xf32>
    %19 = tpu.matmul %16, %17, %cst_12 {dimension_numbers = #tpu.dot_dimension_numbers<[1], [1], [0], [0], [0, 0, 1, 0], [], []>} : vector<16x32xbf16>, vector<16x32xbf16>, vector<16x16xf32> -> vector<16x16xf32>
    %cst_13 = arith.constant 0.176776692 : f32
    %20 = vector.broadcast %cst_13 : f32 to vector<16x16xf32>
    %21 = arith.mulf %19, %20 : vector<16x16xf32>
    %22 = arith.addf %21, %6 : vector<16x16xf32>
    %cst_14 = arith.constant dense<0xFF800000> : vector<16xf32>
    %23 = vector.multi_reduction <maximumf>, %22, %cst_14 [1] : vector<16x16xf32> to vector<16xf32>
    %24 = vector.shape_cast %23 : vector<16xf32> to vector<16x1xf32>
    %25 = vector.broadcast %24 : vector<16x1xf32> to vector<16x16xf32>
    %26 = arith.subf %22, %25 : vector<16x16xf32>
    %27 = math.exp %26 : vector<16x16xf32>
    %cst_15 = arith.constant dense<0.000000e+00> : vector<16xf32>
    %28 = vector.multi_reduction <add>, %27, %cst_15 [1] : vector<16x16xf32> to vector<16xf32>
    %29 = vector.shape_cast %28 : vector<16xf32> to vector<16x1xf32>
    %30 = vector.broadcast %29 : vector<16x1xf32> to vector<16x16xf32>
    %31 = arith.divf %27, %30 : vector<16x16xf32>
    %32 = arith.truncf %31 : vector<16x16xf32> to vector<16x16xbf16>
    %cst_16 = arith.constant dense<0.000000e+00> : vector<16x32xf32>
    %33 = tpu.matmul %32, %18, %cst_16 {dimension_numbers = #tpu.dot_dimension_numbers<[1], [0], [0], [1], [0, 0, 1, 1], [], []>} : vector<16x16xbf16>, vector<16x32xbf16>, vector<16x32xf32> -> vector<16x32xf32>
    %34 = vector.extract_strided_slice %15 {offsets = [0, 32], sizes = [16, 32], strides = [1, 1]} : vector<16x384xbf16> to vector<16x32xbf16>
    %35 = vector.extract_strided_slice %15 {offsets = [0, 160], sizes = [16, 32], strides = [1, 1]} : vector<16x384xbf16> to vector<16x32xbf16>
    %36 = vector.extract_strided_slice %15 {offsets = [0, 288], sizes = [16, 32], strides = [1, 1]} : vector<16x384xbf16> to vector<16x32xbf16>
    %cst_17 = arith.constant dense<0.000000e+00> : vector<16x16xf32>
    %37 = tpu.matmul %34, %35, %cst_17 {dimension_numbers = #tpu.dot_dimension_numbers<[1], [1], [0], [0], [0, 0, 1, 0], [], []>} : vector<16x32xbf16>, vector<16x32xbf16>, vector<16x16xf32> -> vector<16x16xf32>
    %cst_18 = arith.constant 0.176776692 : f32
    %38 = vector.broadcast %cst_18 : f32 to vector<16x16xf32>
    %39 = arith.mulf %37, %38 : vector<16x16xf32>
    %40 = arith.addf %39, %6 : vector<16x16xf32>
    %cst_19 = arith.constant dense<0xFF800000> : vector<16xf32>
    %41 = vector.multi_reduction <maximumf>, %40, %cst_19 [1] : vector<16x16xf32> to vector<16xf32>
    %42 = vector.shape_cast %41 : vector<16xf32> to vector<16x1xf32>
    %43 = vector.broadcast %42 : vector<16x1xf32> to vector<16x16xf32>
    %44 = arith.subf %40, %43 : vector<16x16xf32>
    %45 = math.exp %44 : vector<16x16xf32>
    %cst_20 = arith.constant dense<0.000000e+00> : vector<16xf32>
    %46 = vector.multi_reduction <add>, %45, %cst_20 [1] : vector<16x16xf32> to vector<16xf32>
    %47 = vector.shape_cast %46 : vector<16xf32> to vector<16x1xf32>
    %48 = vector.broadcast %47 : vector<16x1xf32> to vector<16x16xf32>
    %49 = arith.divf %45, %48 : vector<16x16xf32>
    %50 = arith.truncf %49 : vector<16x16xf32> to vector<16x16xbf16>
    %cst_21 = arith.constant dense<0.000000e+00> : vector<16x32xf32>
    %51 = tpu.matmul %50, %36, %cst_21 {dimension_numbers = #tpu.dot_dimension_numbers<[1], [0], [0], [1], [0, 0, 1, 1], [], []>} : vector<16x16xbf16>, vector<16x32xbf16>, vector<16x32xf32> -> vector<16x32xf32>
    %52 = vector.extract_strided_slice %15 {offsets = [0, 64], sizes = [16, 32], strides = [1, 1]} : vector<16x384xbf16> to vector<16x32xbf16>
    %53 = vector.extract_strided_slice %15 {offsets = [0, 192], sizes = [16, 32], strides = [1, 1]} : vector<16x384xbf16> to vector<16x32xbf16>
    %54 = vector.extract_strided_slice %15 {offsets = [0, 320], sizes = [16, 32], strides = [1, 1]} : vector<16x384xbf16> to vector<16x32xbf16>
    %cst_22 = arith.constant dense<0.000000e+00> : vector<16x16xf32>
    %55 = tpu.matmul %52, %53, %cst_22 {dimension_numbers = #tpu.dot_dimension_numbers<[1], [1], [0], [0], [0, 0, 1, 0], [], []>} : vector<16x32xbf16>, vector<16x32xbf16>, vector<16x16xf32> -> vector<16x16xf32>
    %cst_23 = arith.constant 0.176776692 : f32
    %56 = vector.broadcast %cst_23 : f32 to vector<16x16xf32>
    %57 = arith.mulf %55, %56 : vector<16x16xf32>
    %58 = arith.addf %57, %6 : vector<16x16xf32>
    %cst_24 = arith.constant dense<0xFF800000> : vector<16xf32>
    %59 = vector.multi_reduction <maximumf>, %58, %cst_24 [1] : vector<16x16xf32> to vector<16xf32>
    %60 = vector.shape_cast %59 : vector<16xf32> to vector<16x1xf32>
    %61 = vector.broadcast %60 : vector<16x1xf32> to vector<16x16xf32>
    %62 = arith.subf %58, %61 : vector<16x16xf32>
    %63 = math.exp %62 : vector<16x16xf32>
    %cst_25 = arith.constant dense<0.000000e+00> : vector<16xf32>
    %64 = vector.multi_reduction <add>, %63, %cst_25 [1] : vector<16x16xf32> to vector<16xf32>
    %65 = vector.shape_cast %64 : vector<16xf32> to vector<16x1xf32>
    %66 = vector.broadcast %65 : vector<16x1xf32> to vector<16x16xf32>
    %67 = arith.divf %63, %66 : vector<16x16xf32>
    %68 = arith.truncf %67 : vector<16x16xf32> to vector<16x16xbf16>
    %cst_26 = arith.constant dense<0.000000e+00> : vector<16x32xf32>
    %69 = tpu.matmul %68, %54, %cst_26 {dimension_numbers = #tpu.dot_dimension_numbers<[1], [0], [0], [1], [0, 0, 1, 1], [], []>} : vector<16x16xbf16>, vector<16x32xbf16>, vector<16x32xf32> -> vector<16x32xf32>
    %70 = vector.extract_strided_slice %15 {offsets = [0, 96], sizes = [16, 32], strides = [1, 1]} : vector<16x384xbf16> to vector<16x32xbf16>
    %71 = vector.extract_strided_slice %15 {offsets = [0, 224], sizes = [16, 32], strides = [1, 1]} : vector<16x384xbf16> to vector<16x32xbf16>
    %72 = vector.extract_strided_slice %15 {offsets = [0, 352], sizes = [16, 32], strides = [1, 1]} : vector<16x384xbf16> to vector<16x32xbf16>
    %cst_27 = arith.constant dense<0.000000e+00> : vector<16x16xf32>
    %73 = tpu.matmul %70, %71, %cst_27 {dimension_numbers = #tpu.dot_dimension_numbers<[1], [1], [0], [0], [0, 0, 1, 0], [], []>} : vector<16x32xbf16>, vector<16x32xbf16>, vector<16x16xf32> -> vector<16x16xf32>
    %cst_28 = arith.constant 0.176776692 : f32
    %74 = vector.broadcast %cst_28 : f32 to vector<16x16xf32>
    %75 = arith.mulf %73, %74 : vector<16x16xf32>
    %76 = arith.addf %75, %6 : vector<16x16xf32>
    %cst_29 = arith.constant dense<0xFF800000> : vector<16xf32>
    %77 = vector.multi_reduction <maximumf>, %76, %cst_29 [1] : vector<16x16xf32> to vector<16xf32>
    %78 = vector.shape_cast %77 : vector<16xf32> to vector<16x1xf32>
    %79 = vector.broadcast %78 : vector<16x1xf32> to vector<16x16xf32>
    %80 = arith.subf %76, %79 : vector<16x16xf32>
    %81 = math.exp %80 : vector<16x16xf32>
    %cst_30 = arith.constant dense<0.000000e+00> : vector<16xf32>
    %82 = vector.multi_reduction <add>, %81, %cst_30 [1] : vector<16x16xf32> to vector<16xf32>
    %83 = vector.shape_cast %82 : vector<16xf32> to vector<16x1xf32>
    %84 = vector.broadcast %83 : vector<16x1xf32> to vector<16x16xf32>
    %85 = arith.divf %81, %84 : vector<16x16xf32>
    %86 = arith.truncf %85 : vector<16x16xf32> to vector<16x16xbf16>
    %cst_31 = arith.constant dense<0.000000e+00> : vector<16x32xf32>
    %87 = tpu.matmul %86, %72, %cst_31 {dimension_numbers = #tpu.dot_dimension_numbers<[1], [0], [0], [1], [0, 0, 1, 1], [], []>} : vector<16x16xbf16>, vector<16x32xbf16>, vector<16x32xf32> -> vector<16x32xf32>
    %88 = tpu.concatenate %33, %51, %69, %87 in 1 : vector<16x32xf32>, vector<16x32xf32>, vector<16x32xf32>, vector<16x32xf32> -> vector<16x128xf32>
    %89 = arith.truncf %88 : vector<16x128xf32> to vector<16x128xbf16>
    %c0_32 = arith.constant 0 : index
    %c0_33 = arith.constant 0 : index
    %c0_34 = arith.constant 0 : index
    %90 = vector.load %arg8[%c0_32, %c0_33, %c0_34] : memref<1x128x128xbf16, #tpu.memory_space<vmem>>, vector<1x128x128xbf16>
    %91 = vector.shape_cast %90 : vector<1x128x128xbf16> to vector<128x128xbf16>
    %cst_35 = arith.constant dense<0.000000e+00> : vector<16x128xf32>
    %92 = tpu.matmul %89, %91, %cst_35 {dimension_numbers = #tpu.dot_dimension_numbers<[1], [0], [0], [1], [0, 0, 1, 1], [], []>} : vector<16x128xbf16>, vector<128x128xbf16>, vector<16x128xf32> -> vector<16x128xf32>
    %c0_36 = arith.constant 0 : index
    %c0_37 = arith.constant 0 : index
    %c0_38 = arith.constant 0 : index
    %93 = vector.load %arg9[%c0_36, %c0_37, %c0_38] : memref<1x1x128xf32, #tpu.memory_space<vmem>>, vector<1x1x128xf32>
    %94 = vector.shape_cast %93 : vector<1x1x128xf32> to vector<1x128xf32>
    %95 = vector.broadcast %94 : vector<1x128xf32> to vector<16x128xf32>
    %96 = arith.addf %92, %95 : vector<16x128xf32>
    %97 = arith.addf %4, %96 : vector<16x128xf32>
    %c0_39 = arith.constant 0 : index
    %c0_40 = arith.constant 0 : index
    %c0_41 = arith.constant 0 : index
    %98 = vector.load %arg10[%c0_39, %c0_40, %c0_41] : memref<1x1x128xf32, #tpu.memory_space<vmem>>, vector<1x1x128xf32>
    %99 = vector.shape_cast %98 : vector<1x1x128xf32> to vector<1x128xf32>
    %c0_42 = arith.constant 0 : index
    %c0_43 = arith.constant 0 : index
    %c0_44 = arith.constant 0 : index
    %100 = vector.load %arg11[%c0_42, %c0_43, %c0_44] : memref<1x1x128xf32, #tpu.memory_space<vmem>>, vector<1x1x128xf32>
    %101 = vector.shape_cast %100 : vector<1x1x128xf32> to vector<1x128xf32>
    %cst_45 = arith.constant dense<0.000000e+00> : vector<16xf32>
    %102 = vector.multi_reduction <add>, %97, %cst_45 [1] : vector<16x128xf32> to vector<16xf32>
    %103 = vector.shape_cast %102 : vector<16xf32> to vector<16x1xf32>
    %cst_46 = arith.constant 1.280000e+02 : f32
    %104 = vector.broadcast %cst_46 : f32 to vector<16x1xf32>
    %105 = arith.divf %103, %104 : vector<16x1xf32>
    %106 = vector.broadcast %105 : vector<16x1xf32> to vector<16x128xf32>
    %107 = arith.subf %97, %106 : vector<16x128xf32>
    %108 = arith.mulf %107, %107 : vector<16x128xf32>
    %cst_47 = arith.constant dense<0.000000e+00> : vector<16xf32>
    %109 = vector.multi_reduction <add>, %108, %cst_47 [1] : vector<16x128xf32> to vector<16xf32>
    %110 = vector.shape_cast %109 : vector<16xf32> to vector<16x1xf32>
    %cst_48 = arith.constant 1.280000e+02 : f32
    %111 = vector.broadcast %cst_48 : f32 to vector<16x1xf32>
    %112 = arith.divf %110, %111 : vector<16x1xf32>
    %113 = vector.broadcast %105 : vector<16x1xf32> to vector<16x128xf32>
    %114 = arith.subf %97, %113 : vector<16x128xf32>
    %cst_49 = arith.constant 9.99999996E-13 : f32
    %115 = vector.broadcast %cst_49 : f32 to vector<16x1xf32>
    %116 = arith.addf %112, %115 : vector<16x1xf32>
    %117 = math.rsqrt %116 : vector<16x1xf32>
    %118 = vector.broadcast %117 : vector<16x1xf32> to vector<16x128xf32>
    %119 = arith.mulf %114, %118 : vector<16x128xf32>
    %120 = vector.broadcast %99 : vector<1x128xf32> to vector<16x128xf32>
    %121 = arith.mulf %119, %120 : vector<16x128xf32>
    %122 = vector.broadcast %101 : vector<1x128xf32> to vector<16x128xf32>
    %123 = arith.addf %121, %122 : vector<16x128xf32>
    %124 = arith.truncf %123 : vector<16x128xf32> to vector<16x128xbf16>
    %c0_50 = arith.constant 0 : index
    %c0_51 = arith.constant 0 : index
    %c0_52 = arith.constant 0 : index
    %125 = vector.load %arg12[%c0_50, %c0_51, %c0_52] : memref<1x128x512xbf16, #tpu.memory_space<vmem>>, vector<1x128x512xbf16>
    %126 = vector.shape_cast %125 : vector<1x128x512xbf16> to vector<128x512xbf16>
    %cst_53 = arith.constant dense<0.000000e+00> : vector<16x512xf32>
    %127 = tpu.matmul %124, %126, %cst_53 {dimension_numbers = #tpu.dot_dimension_numbers<[1], [0], [0], [1], [0, 0, 1, 1], [], []>} : vector<16x128xbf16>, vector<128x512xbf16>, vector<16x512xf32> -> vector<16x512xf32>
    %c0_54 = arith.constant 0 : index
    %c0_55 = arith.constant 0 : index
    %c0_56 = arith.constant 0 : index
    %128 = vector.load %arg13[%c0_54, %c0_55, %c0_56] : memref<1x1x512xf32, #tpu.memory_space<vmem>>, vector<1x1x512xf32>
    %129 = vector.shape_cast %128 : vector<1x1x512xf32> to vector<1x512xf32>
    %130 = vector.broadcast %129 : vector<1x512xf32> to vector<16x512xf32>
    %131 = arith.addf %127, %130 : vector<16x512xf32>
    %cst_57 = arith.constant 5.000000e-01 : f32
    %132 = vector.broadcast %cst_57 : f32 to vector<16x512xf32>
    %133 = arith.mulf %132, %131 : vector<16x512xf32>
    %cst_58 = arith.constant 4.471500e-02 : f32
    %134 = vector.broadcast %cst_58 : f32 to vector<16x512xf32>
    %135 = arith.mulf %134, %131 : vector<16x512xf32>
    %136 = arith.mulf %135, %131 : vector<16x512xf32>
    %137 = arith.mulf %136, %131 : vector<16x512xf32>
    %138 = arith.addf %131, %137 : vector<16x512xf32>
    %cst_59 = arith.constant 0.797884583 : f32
    %139 = vector.broadcast %cst_59 : f32 to vector<16x512xf32>
    %140 = arith.mulf %139, %138 : vector<16x512xf32>
    %141 = math.tanh %140 : vector<16x512xf32>
    %cst_60 = arith.constant 1.000000e+00 : f32
    %142 = vector.broadcast %cst_60 : f32 to vector<16x512xf32>
    %143 = arith.addf %142, %141 : vector<16x512xf32>
    %144 = arith.mulf %133, %143 : vector<16x512xf32>
    %145 = arith.truncf %144 : vector<16x512xf32> to vector<16x512xbf16>
    %c0_61 = arith.constant 0 : index
    %c0_62 = arith.constant 0 : index
    %c0_63 = arith.constant 0 : index
    %146 = vector.load %arg14[%c0_61, %c0_62, %c0_63] : memref<1x512x128xbf16, #tpu.memory_space<vmem>>, vector<1x512x128xbf16>
    %147 = vector.shape_cast %146 : vector<1x512x128xbf16> to vector<512x128xbf16>
    %cst_64 = arith.constant dense<0.000000e+00> : vector<16x128xf32>
    %148 = tpu.matmul %145, %147, %cst_64 {dimension_numbers = #tpu.dot_dimension_numbers<[1], [0], [0], [1], [0, 0, 1, 1], [], []>} : vector<16x512xbf16>, vector<512x128xbf16>, vector<16x128xf32> -> vector<16x128xf32>
    %c0_65 = arith.constant 0 : index
    %c0_66 = arith.constant 0 : index
    %c0_67 = arith.constant 0 : index
    %149 = vector.load %arg15[%c0_65, %c0_66, %c0_67] : memref<1x1x128xf32, #tpu.memory_space<vmem>>, vector<1x1x128xf32>
    %150 = vector.shape_cast %149 : vector<1x1x128xf32> to vector<1x128xf32>
    %151 = vector.broadcast %150 : vector<1x128xf32> to vector<16x128xf32>
    %152 = arith.addf %148, %151 : vector<16x128xf32>
    %153 = arith.addf %123, %152 : vector<16x128xf32>
    %c0_68 = arith.constant 0 : index
    %c0_69 = arith.constant 0 : index
    %c0_70 = arith.constant 0 : index
    %154 = vector.load %arg16[%c0_68, %c0_69, %c0_70] : memref<1x1x128xf32, #tpu.memory_space<vmem>>, vector<1x1x128xf32>
    %155 = vector.shape_cast %154 : vector<1x1x128xf32> to vector<1x128xf32>
    %c0_71 = arith.constant 0 : index
    %c0_72 = arith.constant 0 : index
    %c0_73 = arith.constant 0 : index
    %156 = vector.load %arg17[%c0_71, %c0_72, %c0_73] : memref<1x1x128xf32, #tpu.memory_space<vmem>>, vector<1x1x128xf32>
    %157 = vector.shape_cast %156 : vector<1x1x128xf32> to vector<1x128xf32>
    %cst_74 = arith.constant dense<0.000000e+00> : vector<16xf32>
    %158 = vector.multi_reduction <add>, %153, %cst_74 [1] : vector<16x128xf32> to vector<16xf32>
    %159 = vector.shape_cast %158 : vector<16xf32> to vector<16x1xf32>
    %cst_75 = arith.constant 1.280000e+02 : f32
    %160 = vector.broadcast %cst_75 : f32 to vector<16x1xf32>
    %161 = arith.divf %159, %160 : vector<16x1xf32>
    %162 = vector.broadcast %161 : vector<16x1xf32> to vector<16x128xf32>
    %163 = arith.subf %153, %162 : vector<16x128xf32>
    %164 = arith.mulf %163, %163 : vector<16x128xf32>
    %cst_76 = arith.constant dense<0.000000e+00> : vector<16xf32>
    %165 = vector.multi_reduction <add>, %164, %cst_76 [1] : vector<16x128xf32> to vector<16xf32>
    %166 = vector.shape_cast %165 : vector<16xf32> to vector<16x1xf32>
    %cst_77 = arith.constant 1.280000e+02 : f32
    %167 = vector.broadcast %cst_77 : f32 to vector<16x1xf32>
    %168 = arith.divf %166, %167 : vector<16x1xf32>
    %169 = vector.broadcast %161 : vector<16x1xf32> to vector<16x128xf32>
    %170 = arith.subf %153, %169 : vector<16x128xf32>
    %cst_78 = arith.constant 9.99999996E-13 : f32
    %171 = vector.broadcast %cst_78 : f32 to vector<16x1xf32>
    %172 = arith.addf %168, %171 : vector<16x1xf32>
    %173 = math.rsqrt %172 : vector<16x1xf32>
    %174 = vector.broadcast %173 : vector<16x1xf32> to vector<16x128xf32>
    %175 = arith.mulf %170, %174 : vector<16x128xf32>
    %176 = vector.broadcast %155 : vector<1x128xf32> to vector<16x128xf32>
    %177 = arith.mulf %175, %176 : vector<16x128xf32>
    %178 = vector.broadcast %157 : vector<1x128xf32> to vector<16x128xf32>
    %179 = arith.addf %177, %178 : vector<16x128xf32>
    %c0_79 = arith.constant 0 : index
    %c0_80 = arith.constant 0 : index
    %c0_81 = arith.constant 0 : index
    %180 = vector.load %arg18[%c0_79, %c0_80, %c0_81] : memref<1x16x128xf32, #tpu.memory_space<vmem>>, vector<1x16x128xf32>
    %181 = vector.shape_cast %180 : vector<1x16x128xf32> to vector<16x128xf32>
    %182 = vector.shape_cast %179 : vector<16x128xf32> to vector<1x16x128xf32>
    tpu.vector_store %arg18[%c0_79, %c0_80, %c0_81], %182 {strides = array<i32>} : memref<1x16x128xf32, #tpu.memory_space<vmem>>, vector<1x16x128xf32>,
    return
  }
  func.func @transform_0(%arg0: i32, %arg1: i32) -> (i32, i32, i32) {
    %c0_i32 = arith.constant 0 : i32
    %c0_i32_0 = arith.constant 0 : i32
    %c0_i32_1 = arith.constant 0 : i32
    return %arg0, %c0_i32, %c0_i32_0 : i32, i32, i32
  }
  func.func @transform_1(%arg0: i32, %arg1: i32) -> (i32, i32, i32) {
    %c0_i32 = arith.constant 0 : i32
    %c0_i32_0 = arith.constant 0 : i32
    %c0_i32_1 = arith.constant 0 : i32
    return %arg0, %c0_i32, %c0_i32_0 : i32, i32, i32
  }
  func.func @transform_2(%arg0: i32, %arg1: i32) -> (i32, i32) {
    %c0_i32 = arith.constant 0 : i32
    %c0_i32_0 = arith.constant 0 : i32
    %c0_i32_1 = arith.constant 0 : i32
    return %c0_i32, %c0_i32_0 : i32, i32
  }
  func.func @transform_3(%arg0: i32, %arg1: i32) -> (i32, i32) {
    %c0_i32 = arith.constant 0 : i32
    %c0_i32_0 = arith.constant 0 : i32
    %c0_i32_1 = arith.constant 0 : i32
    return %c0_i32, %c0_i32_0 : i32, i32
  }
  func.func @transform_4(%arg0: i32, %arg1: i32) -> (i32, i32, i32) {
    %c0_i32 = arith.constant 0 : i32
    %c0_i32_0 = arith.constant 0 : i32
    %c0_i32_1 = arith.constant 0 : i32
    return %arg1, %c0_i32, %c0_i32_0 : i32, i32, i32
  }
  func.func @transform_5(%arg0: i32, %arg1: i32) -> (i32, i32, i32) {
    %c0_i32 = arith.constant 0 : i32
    %c0_i32_0 = arith.constant 0 : i32
    %c0_i32_1 = arith.constant 0 : i32
    return %arg1, %c0_i32, %c0_i32_0 : i32, i32, i32
  }
  func.func @transform_6(%arg0: i32, %arg1: i32) -> (i32, i32, i32) {
    %c0_i32 = arith.constant 0 : i32
    %c0_i32_0 = arith.constant 0 : i32
    %c0_i32_1 = arith.constant 0 : i32
    return %arg1, %c0_i32, %c0_i32_0 : i32, i32, i32
  }
  func.func @transform_7(%arg0: i32, %arg1: i32) -> (i32, i32, i32) {
    %c0_i32 = arith.constant 0 : i32
    %c0_i32_0 = arith.constant 0 : i32
    %c0_i32_1 = arith.constant 0 : i32
    return %arg1, %c0_i32, %c0_i32_0 : i32, i32, i32
  }
  func.func @transform_8(%arg0: i32, %arg1: i32) -> (i32, i32, i32) {
    %c0_i32 = arith.constant 0 : i32
    %c0_i32_0 = arith.constant 0 : i32
    %c0_i32_1 = arith.constant 0 : i32
    return %arg1, %c0_i32, %c0_i32_0 : i32, i32, i32
  }
  func.func @transform_9(%arg0: i32, %arg1: i32) -> (i32, i32, i32) {
    %c0_i32 = arith.constant 0 : i32
    %c0_i32_0 = arith.constant 0 : i32
    %c0_i32_1 = arith.constant 0 : i32
    return %arg1, %c0_i32, %c0_i32_0 : i32, i32, i32
  }
  func.func @transform_10(%arg0: i32, %arg1: i32) -> (i32, i32, i32) {
    %c0_i32 = arith.constant 0 : i32
    %c0_i32_0 = arith.constant 0 : i32
    %c0_i32_1 = arith.constant 0 : i32
    return %arg1, %c0_i32, %c0_i32_0 : i32, i32, i32
  }
  func.func @transform_11(%arg0: i32, %arg1: i32) -> (i32, i32, i32) {
    %c0_i32 = arith.constant 0 : i32
    %c0_i32_0 = arith.constant 0 : i32
    %c0_i32_1 = arith.constant 0 : i32
    return %arg1, %c0_i32, %c0_i32_0 : i32, i32, i32
  }
  func.func @transform_12(%arg0: i32, %arg1: i32) -> (i32, i32, i32) {
    %c0_i32 = arith.constant 0 : i32
    %c0_i32_0 = arith.constant 0 : i32
    %c0_i32_1 = arith.constant 0 : i32
    return %arg1, %c0_i32, %c0_i32_0 : i32, i32, i32
  }
  func.func @transform_13(%arg0: i32, %arg1: i32) -> (i32, i32, i32) {
    %c0_i32 = arith.constant 0 : i32
    %c0_i32_0 = arith.constant 0 : i32
    %c0_i32_1 = arith.constant 0 : i32
    return %arg1, %c0_i32, %c0_i32_0 : i32, i32, i32
  }
  func.func @transform_14(%arg0: i32, %arg1: i32) -> (i32, i32, i32) {
    %c0_i32 = arith.constant 0 : i32
    %c0_i32_0 = arith.constant 0 : i32
    %c0_i32_1 = arith.constant 0 : i32
    return %arg1, %c0_i32, %c0_i32_0 : i32, i32, i32
  }
  func.func @transform_15(%arg0: i32, %arg1: i32) -> (i32, i32, i32) {
    %c0_i32 = arith.constant 0 : i32
    %c0_i32_0 = arith.constant 0 : i32
    %c0_i32_1 = arith.constant 0 : i32
    return %arg1, %c0_i32, %c0_i32_0 : i32, i32, i32
  }
  func.func @transform_16(%arg0: i32, %arg1: i32) -> (i32, i32, i32) {
    %c0_i32 = arith.constant 0 : i32
    %c0_i32_0 = arith.constant 0 : i32
    %c0_i32_1 = arith.constant 0 : i32
    return %arg0, %c0_i32, %c0_i32_0 : i32, i32, i32
  }
}

</mosaic_0001>

<bundles_post_ra>
// kernel: tpu_custom_call.1
= control target key start
LH: loop header
LB: loop body
LE: loop exit
PB: predicated region body
PF: predicated region fallthrough
CT: control target
= control target key end

     0   :  { %s5076_s0 = inlined_call_operand.hbm [shape: f32[2,16,128], index: 0, kind: input, shape index: {}]   ;;  %s5077_s1 = inlined_call_operand.hbm [shape: f32[2,16,16], index: 1, kind: input, shape index: {}]   ;;  %s5078_s2 = inlined_call_operand.hbm [shape: f32[1,128], index: 2, kind: input, shape index: {}]   ;;  %s5079_s3 = inlined_call_operand.hbm [shape: f32[1,128], index: 3, kind: input, shape index: {}]   ;;  %s5080_s4 = inlined_call_operand.hbm [shape: bf16[2,128,384], index: 4, kind: input, shape index: {}]   ;;  %s5081_s5 = inlined_call_operand.vmem [shape: f32[2,1,384], index: 5, kind: input, shape index: {}]   ;;  %s5082_s6 = inlined_call_operand.hbm [shape: bf16[2,128,128], index: 6, kind: input, shape index: {}]   ;;  %s5083_s7 = inlined_call_operand.vmem [shape: f32[2,1,128], index: 7, kind: input, shape index: {}]   ;;  %s5084_s8 = inlined_call_operand.vmem [shape: f32[2,1,128], index: 8, kind: input, shape index: {}]   ;;  %s5085_s9 = inlined_call_operand.vmem [shape: f32[2,1,128], index: 9, kind: input, shape index: {}]   ;;  %s5086_s10 = inlined_call_operand.hbm [shape: bf16[2,128,512], index: 10, kind: input, shape index: {}]   ;;  %s5087_s11 = inlined_call_operand.vmem [shape: f32[2,1,512], index: 11, kind: input, shape index: {}]   ;;  %s5088_s12 = inlined_call_operand.hbm [shape: bf16[2,512,128], index: 12, kind: input, shape index: {}]   ;;  %s5089_s13 = inlined_call_operand.vmem [shape: f32[2,1,128], index: 13, kind: input, shape index: {}]   ;;  %s5090_s14 = inlined_call_operand.vmem [shape: f32[2,1,128], index: 14, kind: input, shape index: {}]   ;;  %s5091_s15 = inlined_call_operand.vmem [shape: f32[2,1,128], index: 15, kind: input, shape index: {}]   ;;  %s5092_s16 = inlined_call_operand.hbm [shape: f32[2,16,128], index: 16, kind: output, shape index: {}]  }
   0x1   :  { %5132 = sst [smem:[#allocation40_spill]] %s5076_s0 }
   0x2   :  { %5133 = sst [smem:[#allocation41_spill]] %s5077_s1 }
   0x3   :  { %5134 = sst [smem:[#allocation42_spill]] %s5078_s2 }
   0x4   :  { %5135 = sst [smem:[#allocation43_spill]] %s5079_s3 }
   0x5   :  { %5136 = sst [smem:[#allocation44_spill]] %s5080_s4 }
   0x6   :  { %5137 = sst [smem:[#allocation45_spill]] %s5081_s5 }
   0x7   :  { %5138 = sst [smem:[#allocation46_spill]] %s5082_s6 }
   0x8   :  { %5139 = sst [smem:[#allocation47_spill]] %s5083_s7 }
   0x9   :  { %5140 = sst [smem:[#allocation48_spill]] %s5084_s8 }
   0xa   :  { %5141 = sst [smem:[#allocation49_spill]] %s5085_s9 }
   0xb   :  { %5142 = sst [smem:[#allocation50_spill]] %s5086_s10 }
   0xc   :  { %5143 = sst [smem:[#allocation51_spill]] %s5087_s11 }
   0xd   :  { %5144 = sst [smem:[#allocation52_spill]] %s5088_s12 }
   0xe   :  { %5145 = sst [smem:[#allocation53_spill]] %s5089_s13 }
   0xf   :  { %5146 = sst [smem:[#allocation54_spill]] %s5090_s14 }
  0x10   :  { %5147 = sst [smem:[#allocation55_spill]] %s5091_s15 }
  0x11   :  { %5148 = sst [smem:[#allocation56_spill]] %s5092_s16 }
  0x12   :  { %21 = vsyncpa [#allocation3], 0 }
  0x13   :  { %23 = vsyncpa [#allocation3 + $0x1], 0 }
  0x14   :  { %24 = vsyncpa [#allocation6], 0 }
  0x15   :  { %26 = vsyncpa [#allocation6 + $0x1], 0 }
  0x16   :  { %27 = vsyncpa [#allocation9], 0 }
  0x17   :  { %28 = vsyncpa [#allocation4], 0 }
  0x18   :  { %30 = vsyncpa [#allocation4 + $0x1], 0  ;;  %s4135_s21 = smov 0   ;;  %s4137_s22 = smov 0  }
  0x19   :  { %s4139_s23 = smov 0   ;;  %s4141_s24 = smov 0  }
  0x1a   :  { %s4143_s25 = smov 0   ;;  %s4145_s26 = smov 0  }
  0x1b   :  { %s4147_s27 = smov 0   ;;  %s4149_s28 = smov 0  }
  0x1c   :  { %s4151_s29 = smov 0   ;;  %s4153_s30 = smov 0  }
  0x1d   :  { %s4155_s0 = smov 0  }
  0x1e LB: > { %5149 = sst [smem:[#allocation24_spill]] %s3987_s22  ;;  %s4189_s17 = sadd.s32 4294967295, %s4023_s0   ;;  %s4023_s0 = sphi %s4155_s0, %s36_s0   ;;  %s4019_s30 = sphi %s4153_s30, %s5248_s30   ;;  %s4015_s29 = sphi %s4151_s29, %s5247_s29   ;;  %s4011_s28 = sphi %s4149_s28, %s5246_s28   ;;  %s4007_s27 = sphi %s4147_s27, %s5245_s27   ;;  %s4003_s26 = sphi %s4145_s26, %s5244_s26   ;;  %s3999_s25 = sphi %s4143_s25, %s5243_s25   ;;  %s3995_s24 = sphi %s4141_s24, %s5242_s24   ;;  %s3991_s23 = sphi %s4139_s23, %s5250_s23   ;;  %s3987_s22 = sphi %s4137_s22, %s5249_s22   ;;  %s3983_s21 = sphi %s4135_s21, %s5240_s21  }
  0x1f   : > { %5150 = sst [smem:[#allocation25_spill]] %s3995_s24  ;;  %s2953_s18 = sadd.s32 4294967294, %s4023_s0  }
  0x20   : > { %5151 = sst [smem:[#allocation26_spill]] %s3999_s25  ;;  %p5098_p0 = scmp.eq.s32.totalorder %s4023_s0, 0 }
  0x21   : > { %5152 = sst [smem:[#allocation27_spill]] %s4003_s26  ;;  %p68_p1 = scmp.ne.s32.totalorder %s3999_s25, %s3995_s24 }
  0x22   : > { %5153 = sst [smem:[#allocation28_spill]] %s4007_s27  ;;  %p5097_p2 = scmp.eq.s32.totalorder %s4189_s17, 0 }
  0x23   : > { %5154 = sst [smem:[#allocation29_spill]] %s4011_s28  ;;  %p156_p3 = scmp.ne.s32.totalorder %s3991_s23, %s3987_s22 }
  0x24   : > { %5155 = sst [smem:[#allocation30_spill]] %s4015_s29  ;;  %p162_p4 = scmp.ne.s32.totalorder %s3987_s22, %s3983_s21 }
  0x25   : > { %5156 = sst [smem:[#allocation31_spill]] %s4019_s30  ;;  %p4202_p5 = por %p5097_p2, %p68_p1 }
  0x26   : > { %p4209_p7 = por %p156_p3, %p5098_p0  ;;  %p4215_p8 = por %p162_p4, %p5097_p2 }
  0x27   : > { %s5157_s20 = scalar_select %p4202_p5, 1, 0 }
  0x28   : > { %s5159_s16 = scalar_select %p4209_p7, 1, 0 }
  0x29   : > { %5158 = sst [smem:[#allocation32_spill]] %s5157_s20  ;;  %p478_p9 = scmp.eq.s32.totalorder %s2953_s18, 3 }
  0x2a   : > { %s5160_s24 = scalar_select %p4215_p8, 1, 0 }
  0x2b   : > { %p2954_p10 = scmp.ge.s32.totalorder %s4023_s0, 1  ;;  %p485_p11 = scmp.lt.s32.totalorder %s4023_s0, 5 }
  0x2c   : > { %5161 = sst [smem:[#allocation33_spill]] %s5160_s24  ;;  %p4221_p12 = por %p478_p9, %p68_p1 }
  0x2d   : > { %p4225_p13 = pnand %p2954_p10, %p485_p11  ;;  %s4025_s28 = smov [#allocation7]  }
  0x2e   : > { %s5162_s21 = scalar_select %p4221_p12, 1, 0 }
  0x2f   : > { %s5164_s19 = scalar_select %p4225_p13, 1, 0 }
  0x30   : > { %5163 = sst [smem:[#allocation34_spill]] %s5162_s21  ;;  %s498_s15 = sshll.u32 %s4025_s28, 4  ;;  %s499_s15 = int_to_ptr.vmem [resolvable:$true] %s498_s15 }
  0x31   : > { %p3300_p3 = pneg %p4225_p13  ;;  %s45_s18 = sadd.s32 1, %s4015_s29 }
  0x32   : > { %s5166_s2 = sld [smem:[#allocation42_spill]] }
  0x33   : > { %p4233_p4 = pnand %p3300_p3, %p5097_p2 }
  0x35   : > { %s5165_s14 = scalar_select %p4233_p4, 1, 0 }
  0x36   : > { %p5115_p9 = pneg %p4233_p4 }
  0x38   : > { %s3637_s11 = scalar_lea.hbm %s5166_s2, 16 }
  0x39   : > { %p3638_p1 = scmp.ne.s32.totalorder %s5166_s2, %s3637_s11  ;;  %p3644_p3 = scmp.lt.u32.totalorder %s3637_s11, %s5166_s2 }
  0x3b   : > { %p3640_p10 = pnand %p5115_p9, %p3638_p1 }
  0x3d   : > { %p3641_p11 = pneg %p3640_p10 }
  0x3f   : > { %p3646_p2 = pnand %p3644_p3, %p3641_p11 }
  0x41   : > { %3649 = shalt.err (!%p3646_p2)
}
  0x42   : > { %s3650_s7 = scalar_lea.vmem %s499_s15, 16  ;;  %s3657_s5 = scalar_lea.vmem %s499_s15, 32 }
  0x43   : > { %p3651_p6 = scmp.ne.s32.totalorder %s499_s15, %s3650_s7  ;;  %p3658_p8 = scmp.lt.s32.totalorder %s499_s15, %s499_s15 }
  0x44   : > { %p3659_p5 = scmp.lt.s32.totalorder %s3657_s5, %s3650_s7 }
  0x45   : > { %p3653_p0 = pnand %p3651_p6, %p5115_p9 }
  0x46   : > { %p3660_p13 = por %p3659_p5, %p3658_p8 }
  0x47   : > { %p3654_p12 = pneg %p3653_p0 }
  0x49   : > { %p3661_p7 = pnand %p3660_p13, %p3654_p12 }
  0x4b   : > { %3664 = shalt.err (!%p3661_p7)
}
  0x4c   : > { %3303 = dma.hbm_to_vmem [thread:$0]  (!%p4233_p4), %s5166_s2, 16, %s499_s15, [#allocation6]  }
  0x4d   : > { %p46_p0 = scmp.ge.s32.totalorder %s45_s18, 2  ;;  %s48_s7 = sadd.s32 1, %s4019_s30 }
  0x4e   : > { %s55_s11 = sadd.s32 1, %s4003_s26  ;;  %p62_p2 = scmp.ne.s32.totalorder %s4003_s26, %s3999_s25 }
  0x4f   : > { %s5252_s18 = smov (%p46_p0, %s45_s18), 0  ;;  %s5254_s7 = smov (!%p46_p0, %s48_s7), %s4019_s30 }
  0x50   : > { %5167 = sst [smem:[#allocation35_spill]] %s5252_s18  ;;  %p5168_p5 = scmp.eq.s32.totalorder %s4023_s0, 0 }
  0x51   : > { %s146_s15 = ssub.s32 %s4015_s29, %s5252_s18  ;;  %p50_p7 = scmp.ge.s32.totalorder %s5254_s7, 2 }
  0x52   : > { %p4269_p6 = por %p5168_p5, %p62_p2  ;;  %p147_p8 = scmp.eq.s32.totalorder %s146_s15, 0 }
  0x53   : > { %p5170_p12 = scmp.eq.s32.totalorder %s4189_s17, 3  ;;  %p5116_p1 = scmp.lt.s32.totalorder %s4023_s0, 4 }
  0x54   : > { %s5256_s7 = smov (%p50_p7, %s5254_s7), 0  ;;  %s5174_s28 = sadd.s32 1, %s3991_s23 }
  0x55   : > { %p4277_p13 = por %p5170_p12, %p62_p2  ;;  %5173 = sst [smem:[#allocation37_spill]] %s5256_s7 }
  0x56   : > { %s4287_s5 = scalar_select %p147_p8, %s3991_s23, %s5174_s28  }
  0x57   : > { %s5171_s21 = scalar_select %p4277_p13, 1, 0 }
  0x58   : > { %5175 = sst [smem:[#allocation38_spill]] %s4287_s5  ;;  %s52_s9 = ssub.s32 %s4019_s30, %s5256_s7 }
  0x59   : > { %5172 = sst [smem:[#allocation36_spill]] %s5171_s21  ;;  %s5118_s8 = sand.u32 1, %s4023_s0  }
  0x5a   : > { %p53_p10 = scmp.eq.s32.totalorder %s52_s9, 0  ;;  %s522_s2 = sand.u32 1, %s4003_s26  }
  0x5b   : > { %s5113_s18 = sshll.u32 %s4019_s30, 8  ;;  %s4297_s15 = sshll.u32 %s522_s2, 4 }
  0x5c   : > { %s4295_s27 = scalar_select %p53_p10, %s4003_s26, %s55_s11  }
  0x5d   : > { %s5177_s22 = sld [smem:[#allocation40_spill]]  ;;  %p4310_p11 = pnand %p5116_p1, %p4269_p6 }
  0x5e   : > { %5176 = sst [smem:[#allocation39_spill]] %s4295_s27  ;;  %s524_s2 = scalar_lea.vmem [#allocation2], %s4297_s15 }
  0x5f   : > { %s531_s11 = sshll.u32 %s524_s2, 4  ;;  %s4319_s24 = scalar_lea.sflag [#allocation3], %s5118_s8  ;;  %s4315_s11 = int_to_ptr.vmem [resolvable:$true] %s531_s11 }
  0x60   : > { %p3667_p0 = pneg %p4310_p11 }
  0x63   : > { %s5178_s20 = smov %s5177_s22  ;;  %s4304_s25 = scalar_lea.hbm %s5177_s22, %s5113_s18 }
  0x64   : > { %s3665_s22 = scalar_lea.hbm %s4304_s25, 256  ;;  %s3670_s9 = scalar_lea.hbm %s5178_s20, 512 }
  0x65   : > { %p3666_p3 = scmp.ne.s32.totalorder %s4304_s25, %s3665_s22  ;;  %p3671_p6 = scmp.lt.u32.totalorder %s4304_s25, %s5178_s20 }
  0x66   : > { %p3672_p7 = scmp.lt.u32.totalorder %s3670_s9, %s3665_s22  ;;  %p3674_p12 = scmp.lt.u32.totalorder %s3665_s22, %s4304_s25 }
  0x67   : > { %p3668_p2 = pnand %p3667_p0, %p3666_p3 }
  0x68   : > { %p3673_p8 = por %p3672_p7, %p3671_p6 }
  0x69   : > { %p3669_p5 = pneg %p3668_p2 }
  0x6a   : > { %p3675_p10 = por %p3674_p12, %p3673_p8 }
  0x6c   : > { %p3676_p9 = pnand %p3675_p10, %p3669_p5 }
  0x6e   : > { %3679 = shalt.err (!%p3676_p9)
}
  0x6f   : > { %s3680_s2 = scalar_lea.vmem %s4315_s11, 256  ;;  %s4026_s13 = smov [#allocation2]  }
  0x70   : > { %p3681_p3 = scmp.ne.s32.totalorder %s4315_s11, %s3680_s2  ;;  %s3685_s21 = sshll.u32 %s4026_s13, 4  ;;  %s3686_s21 = int_to_ptr.vmem [resolvable:$false] %s3685_s21 }
  0x71   : > { %s3687_s18 = scalar_lea.vmem %s3686_s21, 512  ;;  %p3688_p13 = scmp.lt.s32.totalorder %s4315_s11, %s3686_s21 }
  0x72   : > { %p3683_p2 = pnand %p3681_p3, %p3667_p0  ;;  %p3689_p6 = scmp.lt.s32.totalorder %s3687_s18, %s3680_s2 }
  0x74   : > { %p3684_p1 = pneg %p3683_p2  ;;  %p3690_p7 = por %p3689_p6, %p3688_p13 }
  0x76   : > { %p3691_p8 = pnand %p3690_p7, %p3684_p1 }
  0x78   : > { %3694 = shalt.err (!%p3691_p8)
}
  0x79   : > { %s5120_s7 = smov 128   ;;  %s5121_s22 = smov 8  }
  0x7a   : > { %3310 = dma.hbm_to_vmem [thread:$0]  (!%p4310_p11), %s4304_s25, 256, %s4315_s11, %s4319_s24, %s5120_s7, %s5120_s7, %s5121_s22  }
  0x7b   : > { %s5180_s9 = sshll.u32 %s4019_s30, 8  ;;  %s5181_s1 = sld [smem:[#allocation41_spill]] }
  0x7c   : > { %s545_s18 = scalar_lea.vmem [#allocation5], %s4297_s15  ;;  %p5182_p9 = scmp.ne.s32.totalorder %s5159_s16, 0 }
  0x7d   : > { %s552_s8 = sshll.u32 %s545_s18, 4  ;;  %p5183_p13 = scmp.lt.s32.totalorder %s4023_s0, 4  ;;  %s4366_s8 = int_to_ptr.vmem [resolvable:$true] %s552_s8 }
  0x7e   : > { %s4369_s25 = sand.u32 1, %s3991_s23  }
  0x7f   : > { %p4362_p1 = pnand %p5183_p13, %p5182_p9  ;;  %s3274_s11 = smul.u32 192, %s4369_s25 }
  0x81   : > { %s4355_s21 = scalar_lea.hbm %s5181_s1, %s5180_s9  ;;  %s5185_s9 = sand.u32 1, %s4023_s0  }
  0x82   : > { %s5184_s20 = scalar_select %p4362_p1, 1, 0 }
  0x83   : > { %s4374_s2 = scalar_lea.sflag [#allocation6], %s5185_s9  ;;  %s3695_s13 = scalar_lea.hbm %s4355_s21, 256 }
  0x84   : > { %p3696_p5 = scmp.ne.s32.totalorder %s4355_s21, %s3695_s13  ;;  %s3700_s18 = scalar_lea.hbm %s5181_s1, 512 }
  0x85   : > { %p3701_p3 = scmp.lt.u32.totalorder %s4355_s21, %s5181_s1  ;;  %p3702_p2 = scmp.lt.u32.totalorder %s3700_s18, %s3695_s13 }
  0x86   : > { %p3698_p12 = pnand %p3696_p5, %p3667_p0  ;;  %p3704_p7 = scmp.lt.u32.totalorder %s3695_s13, %s4355_s21 }
  0x87   : > { %p3703_p6 = por %p3702_p2, %p3701_p3 }
  0x88   : > { %p3699_p10 = pneg %p3698_p12 }
  0x89   : > { %p3705_p8 = por %p3704_p7, %p3703_p6 }
  0x8b   : > { %p3706_p9 = pnand %p3705_p8, %p3699_p10 }
  0x8d   : > { %3709 = shalt.err (!%p3706_p9)
}
  0x8e   : > { %s3710_s9 = scalar_lea.vmem %s4366_s8, 256  ;;  %s4029_s16 = smov [#allocation5]  }
  0x8f   : > { %p3711_p13 = scmp.ne.s32.totalorder %s4366_s8, %s3710_s9  ;;  %s3715_s15 = sshll.u32 %s4029_s16, 4  ;;  %s3716_s15 = int_to_ptr.vmem [resolvable:$false] %s3715_s15 }
  0x90   : > { %s3717_s7 = scalar_lea.vmem %s3716_s15, 512  ;;  %p3718_p4 = scmp.lt.s32.totalorder %s4366_s8, %s3716_s15 }
  0x91   : > { %p3713_p5 = pnand %p3711_p13, %p3667_p0  ;;  %p3719_p3 = scmp.lt.s32.totalorder %s3717_s7, %s3710_s9 }
  0x93   : > { %p3714_p12 = pneg %p3713_p5  ;;  %p3720_p2 = por %p3719_p3, %p3718_p4 }
  0x95   : > { %p3721_p6 = pnand %p3720_p2, %p3714_p12 }
  0x97   : > { %3724 = shalt.err (!%p3721_p6)
}
  0x98   : > { %s5186_s22 = smov 8   ;;  %s5187_s13 = smov 128  }
  0x99   : > { %3313 = dma.hbm_to_vmem [thread:$0]  (!%p4310_p11), %s4355_s21, 256, %s4366_s8, %s4374_s2, %s5187_s13, %s5187_s13, %s5186_s22  }
  0x9a   : > { %s3275_s18 = smul.u32 3072, %s4015_s29  ;;  %s566_s16 = scalar_lea.vmem [#allocation10], %s3274_s11 }
  0x9b   : > { %s573_s9 = sshll.u32 %s566_s16, 4  ;;  %s5188_s4 = sld [smem:[#allocation44_spill]]  ;;  %s4411_s9 = int_to_ptr.vmem [resolvable:$true] %s573_s9 }
  0x9c   : > { %s2965_s28 = sshll.u32 %s4369_s25, 6  ;;  %p4418_p11 = pneg %p4362_p1 }
  0x9e   : > { %s5189_s8 = scalar_select %p4418_p11, 1, 0 }
  0xa1   : > { %s4409_s1 = scalar_lea.hbm %s5188_s4, %s3275_s18  ;;  %s3730_s22 = scalar_lea.hbm %s5188_s4, 6144 }
  0xa2   : > { %s3725_s30 = scalar_lea.hbm %s4409_s1, 3072  ;;  %p3731_p7 = scmp.lt.u32.totalorder %s4409_s1, %s5188_s4 }
  0xa3   : > { %p3726_p4 = scmp.ne.s32.totalorder %s4409_s1, %s3725_s30  ;;  %p3732_p8 = scmp.lt.u32.totalorder %s3730_s22, %s3725_s30 }
  0xa4   : > { %p3734_p13 = scmp.lt.u32.totalorder %s3725_s30, %s4409_s1 }
  0xa5   : > { %p3728_p0 = pnand %p4418_p11, %p3726_p4  ;;  %p3733_p9 = por %p3732_p8, %p3731_p7 }
  0xa7   : > { %p3729_p10 = pneg %p3728_p0  ;;  %p3735_p5 = por %p3734_p13, %p3733_p9 }
  0xa9   : > { %p3736_p12 = pnand %p3735_p5, %p3729_p10 }
  0xab   : > { %3739 = shalt.err (!%p3736_p12)
}
  0xac   : > { %s3740_s16 = scalar_lea.vmem %s4411_s9, 3072  ;;  %s4030_s15 = smov [#allocation10]  }
  0xad   : > { %p3741_p3 = scmp.ne.s32.totalorder %s4411_s9, %s3740_s16  ;;  %s3745_s7 = sshll.u32 %s4030_s15, 4  ;;  %s3746_s7 = int_to_ptr.vmem [resolvable:$false] %s3745_s7 }
  0xae   : > { %s3747_s21 = scalar_lea.vmem %s3746_s7, 6144  ;;  %p3748_p4 = scmp.lt.s32.totalorder %s4411_s9, %s3746_s7 }
  0xaf   : > { %p3743_p2 = pnand %p3741_p3, %p4418_p11  ;;  %p3749_p0 = scmp.lt.s32.totalorder %s3747_s21, %s3740_s16 }
  0xb1   : > { %p3744_p6 = pneg %p3743_p2  ;;  %p3750_p7 = por %p3749_p0, %p3748_p4 }
  0xb3   : > { %p3751_p8 = pnand %p3750_p7, %p3744_p6 }
  0xb5   : > { %3754 = shalt.err (!%p3751_p8)
}
  0xb6   : > { %s4031_s30 = smov 192   ;;  %s4032_s11 = smov 12  }
  0xb7   : > { %3316 = dma.hbm_to_vmem [thread:$0]  (!%p4362_p1), %s4409_s1, 3072, %s4411_s9, %s4319_s24, %s4031_s30, %s4031_s30, %s4032_s11  }
  0xb8   : > { %s3104_s22 = sshll.u32 %s4015_s29, 10  ;;  %s5190_s6 = sld [smem:[#allocation46_spill]] }
  0xb9   : > { %s594_s16 = scalar_lea.vmem [#allocation11], %s2965_s28 }
  0xba   : > { %s601_s7 = sshll.u32 %s594_s16, 4  ;;  %s4450_s7 = int_to_ptr.vmem [resolvable:$true] %s601_s7 }
  0xbe   : > { %s4446_s15 = scalar_lea.hbm %s5190_s6, %s3104_s22  ;;  %s3760_s30 = scalar_lea.hbm %s5190_s6, 2048 }
  0xbf   : > { %s3755_s21 = scalar_lea.hbm %s4446_s15, 1024  ;;  %p3761_p5 = scmp.lt.u32.totalorder %s4446_s15, %s5190_s6 }
  0xc0   : > { %p3756_p10 = scmp.ne.s32.totalorder %s4446_s15, %s3755_s21  ;;  %p3762_p12 = scmp.lt.u32.totalorder %s3760_s30, %s3755_s21 }
  0xc1   : > { %p3764_p2 = scmp.lt.u32.totalorder %s3755_s21, %s4446_s15 }
  0xc2   : > { %p3758_p9 = pnand %p3756_p10, %p4418_p11  ;;  %p3763_p3 = por %p3762_p12, %p3761_p5 }
  0xc4   : > { %p3759_p13 = pneg %p3758_p9  ;;  %p3765_p6 = por %p3764_p2, %p3763_p3 }
  0xc6   : > { %p3766_p4 = pnand %p3765_p6, %p3759_p13 }
  0xc8   : > { %3769 = shalt.err (!%p3766_p4)
}
  0xc9   : > { %s3770_s28 = scalar_lea.vmem %s4450_s7, 1024  ;;  %s4033_s13 = smov [#allocation11]  }
  0xca   : > { %p3771_p0 = scmp.ne.s32.totalorder %s4450_s7, %s3770_s28  ;;  %s3775_s18 = sshll.u32 %s4033_s13, 4  ;;  %s3776_s18 = int_to_ptr.vmem [resolvable:$false] %s3775_s18 }
  0xcb   : > { %s3777_s16 = scalar_lea.vmem %s3776_s18, 2048  ;;  %p3778_p10 = scmp.lt.s32.totalorder %s4450_s7, %s3776_s18 }
  0xcc   : > { %p3773_p7 = pnand %p3771_p0, %p4418_p11  ;;  %p3779_p9 = scmp.lt.s32.totalorder %s3777_s16, %s3770_s28 }
  0xce   : > { %p3774_p8 = pneg %p3773_p7  ;;  %p3780_p5 = por %p3779_p9, %p3778_p10 }
  0xd0   : > { %p3781_p12 = pnand %p3780_p5, %p3774_p8 }
  0xd2   : > { %3784 = shalt.err (!%p3781_p12)
}
  0xd3   : > { %s4034_s21 = smov 64   ;;  %s4035_s1 = smov 4  }
  0xd4   : > { %3319 = dma.hbm_to_vmem [thread:$0]  (!%p4362_p1), %s4446_s15, 1024, %s4450_s7, %s4374_s2, %s4034_s21, %s4034_s21, %s4035_s1  }
  0xd5   : > { %s4036_s9 = smov [#allocation8]   ;;  %s2968_s11 = sshll.u32 %s4369_s25, 8 }
  0xd6   : > { %s509_s30 = sshll.u32 %s4036_s9, 4  ;;  %s5191_s3 = sld [smem:[#allocation43_spill]]  ;;  %s510_s30 = int_to_ptr.vmem [resolvable:$true] %s509_s30 }
  0xd7   : > { %p5192_p3 = scmp.ne.s32.totalorder %s5165_s14, 0 }
  0xd9   : > { %p5193_p2 = pneg %p5192_p3 }
  0xdc   : > { %s3785_s13 = scalar_lea.hbm %s5191_s3, 16 }
  0xdd   : > { %p3786_p13 = scmp.ne.s32.totalorder %s5191_s3, %s3785_s13  ;;  %p3792_p0 = scmp.lt.u32.totalorder %s3785_s13, %s5191_s3 }
  0xdf   : > { %p3788_p6 = pnand %p3786_p13, %p5193_p2 }
  0xe1   : > { %p3789_p4 = pneg %p3788_p6 }
  0xe3   : > { %p3794_p7 = pnand %p3792_p0, %p3789_p4 }
  0xe5   : > { %3797 = shalt.err (!%p3794_p7)
}
  0xe6   : > { %s3798_s15 = scalar_lea.vmem %s510_s30, 16  ;;  %p5194_p10 = pmov %p5193_p2 }
  0xe7   : > { %p3799_p8 = scmp.ne.s32.totalorder %s510_s30, %s3798_s15  ;;  %s3805_s7 = scalar_lea.vmem %s510_s30, 32 }
  0xe8   : > { %p3806_p12 = scmp.lt.s32.totalorder %s510_s30, %s510_s30  ;;  %p3807_p1 = scmp.lt.s32.totalorder %s3805_s7, %s3798_s15 }
  0xe9   : > { %p3801_p9 = pnand %p3799_p8, %p5194_p10 }
  0xea   : > { %p3808_p11 = por %p3807_p1, %p3806_p12 }
  0xeb   : > { %p3802_p5 = pneg %p3801_p9 }
  0xed   : > { %p3809_p2 = pnand %p3808_p11, %p3802_p5 }
  0xef   : > { %3812 = shalt.err (!%p3809_p2)
}
  0xf0   : > { %3306 = dma.hbm_to_vmem [thread:$0]  (!%p5192_p3), %s5191_s3, 16, %s510_s30, [#allocation9]  }
  0xf1   : > { %s3105_s6 = sshll.u32 %s4015_s29, 12  ;;  %s633_s22 = scalar_lea.vmem [#allocation12], %s2968_s11 }
  0xf2   : > { %s640_s28 = sshll.u32 %s633_s22, 4  ;;  %s5195_s10 = sld [smem:[#allocation50_spill]]  ;;  %s4508_s28 = int_to_ptr.vmem [resolvable:$true] %s640_s28 }
  0xf3   : > { %p5196_p11 = scmp.ne.s32.totalorder %s5189_s8, 0 }
  0xf8   : > { %s4506_s16 = scalar_lea.hbm %s5195_s10, %s3105_s6  ;;  %s3818_s7 = scalar_lea.hbm %s5195_s10, 8192 }
  0xf9   : > { %s3813_s14 = scalar_lea.hbm %s4506_s16, 4096  ;;  %p3819_p6 = scmp.lt.u32.totalorder %s4506_s16, %s5195_s10 }
  0xfa   : > { %p3814_p1 = scmp.ne.s32.totalorder %s4506_s16, %s3813_s14  ;;  %p3820_p4 = scmp.lt.u32.totalorder %s3818_s7, %s3813_s14 }
  0xfb   : > { %p3822_p7 = scmp.lt.u32.totalorder %s3813_s14, %s4506_s16 }
  0xfc   : > { %p3816_p13 = pnand %p3814_p1, %p5196_p11  ;;  %p3821_p0 = por %p3820_p4, %p3819_p6 }
  0xfe   : > { %p3817_p3 = pneg %p3816_p13  ;;  %p3823_p8 = por %p3822_p7, %p3821_p0 }
 0x100   : > { %p3824_p10 = pnand %p3823_p8, %p3817_p3 }
 0x102   : > { %3827 = shalt.err (!%p3824_p10)
}
 0x103   : > { %s3828_s22 = scalar_lea.vmem %s4508_s28, 4096  ;;  %s4037_s13 = smov [#allocation12]  }
 0x104   : > { %p3829_p9 = scmp.ne.s32.totalorder %s4508_s28, %s3828_s22  ;;  %s3833_s18 = sshll.u32 %s4037_s13, 4  ;;  %s3834_s18 = int_to_ptr.vmem [resolvable:$false] %s3833_s18 }
 0x105   : > { %s3835_s30 = scalar_lea.vmem %s3834_s18, 8192  ;;  %p3836_p2 = scmp.lt.s32.totalorder %s4508_s28, %s3834_s18 }
 0x106   : > { %p3831_p5 = pnand %p3829_p9, %p5196_p11  ;;  %p3837_p1 = scmp.lt.s32.totalorder %s3835_s30, %s3828_s22 }
 0x108   : > { %p3832_p12 = pneg %p3831_p5  ;;  %p3838_p13 = por %p3837_p1, %p3836_p2 }
 0x10a   : > { %p3839_p6 = pnand %p3838_p13, %p3832_p12 }
 0x10c   : > { %3842 = shalt.err (!%p3839_p6)
}
 0x10d   : > { %s4038_s14 = smov 256   ;;  %s4039_s15 = smov 16  }
 0x10e   : > { %p5197_p3 = scmp.ne.s32.totalorder %s5184_s20, 0  ;;  %s5198_s12 = sld [smem:[#allocation52_spill]] }
 0x10f   : > { %s661_s22 = scalar_lea.vmem [#allocation13], %s2968_s11 }
 0x110   : > { %3322 = dma.hbm_to_vmem [thread:$0]  (!%p5197_p3), %s4506_s16, 4096, %s4508_s28, %s4319_s24, %s4038_s14, %s4038_s14, %s4039_s15  }
 0x111   : > { %s668_s13 = sshll.u32 %s661_s22, 4  ;;  %s4541_s13 = int_to_ptr.vmem [resolvable:$true] %s668_s13 }
 0x114   : > { %s4537_s4 = scalar_lea.hbm %s5198_s12, %s3105_s6  ;;  %s3848_s16 = scalar_lea.hbm %s5198_s12, 8192 }
 0x115   : > { %s3843_s18 = scalar_lea.hbm %s4537_s4, 4096  ;;  %p3849_p8 = scmp.lt.u32.totalorder %s4537_s4, %s5198_s12 }
 0x116   : > { %p3844_p4 = scmp.ne.s32.totalorder %s4537_s4, %s3843_s18  ;;  %p3850_p10 = scmp.lt.u32.totalorder %s3848_s16, %s3843_s18 }
 0x117   : > { %p3852_p5 = scmp.lt.u32.totalorder %s3843_s18, %s4537_s4 }
 0x118   : > { %p3846_p0 = pnand %p3844_p4, %p5196_p11  ;;  %p3851_p9 = por %p3850_p10, %p3849_p8 }
 0x11a   : > { %p3847_p7 = pneg %p3846_p0  ;;  %p3853_p12 = por %p3852_p5, %p3851_p9 }
 0x11c   : > { %p3854_p2 = pnand %p3853_p12, %p3847_p7 }
 0x11e   : > { %3857 = shalt.err (!%p3854_p2)
}
 0x11f   : > { %s3858_s25 = scalar_lea.vmem %s4541_s13, 4096  ;;  %s4040_s11 = smov [#allocation13]  }
 0x120   : > { %p3859_p1 = scmp.ne.s32.totalorder %s4541_s13, %s3858_s25  ;;  %s3863_s14 = sshll.u32 %s4040_s11, 4  ;;  %s3864_s14 = int_to_ptr.vmem [resolvable:$false] %s3863_s14 }
 0x121   : > { %s3865_s15 = scalar_lea.vmem %s3864_s14, 8192  ;;  %p3866_p4 = scmp.lt.s32.totalorder %s4541_s13, %s3864_s14 }
 0x122   : > { %p3861_p13 = pnand %p3859_p1, %p5196_p11  ;;  %p3867_p0 = scmp.lt.s32.totalorder %s3865_s15, %s3858_s25 }
 0x124   : > { %p3862_p6 = pneg %p3861_p13  ;;  %p3868_p8 = por %p3867_p0, %p3866_p4 }
 0x126   : > { %p3869_p10 = pnand %p3868_p8, %p3862_p6 }
 0x128   : > { %3872 = shalt.err (!%p3869_p10)
}
 0x129   : > { %3325 = dma.hbm_to_vmem [thread:$0]  (!%p5197_p3), %s4537_s4, 4096, %s4541_s13, %s4374_s2, %s4034_s21, %s4034_s21, %s4035_s1  }
 0x12a   : > { %p5199_p11 = scmp.ne.s32.totalorder %s5164_s19, 0 }
 0x12b   : > { %s5200_s8 = sld [smem:[#allocation26_spill]] (!%p5199_p11)  ;;  %s5201_s7 = sld [smem:[#allocation32_spill]] (!%p5199_p11) }
 0x12c   : > { %698 = sbr.rel (%p5199_p11) target bundleno = 3703 (0xe77), region = 84  ;;  %s700_s9 = sand.u32 (!%p5199_p11), 1, %s4189_s17  }
 0x12d   : > { %s701_s20 = scalar_lea.sflag (!%p5199_p11), [#allocation3], %s700_s9 }
 0x131   : > { %s5129_s22 = sand.u32 (!%p5199_p11), 1, %s5200_s8   ;;  %p5202_p7 = scmp.ne.s32.totalorder (!%p5199_p11), %s5201_s7, 0 }
 0x132   : > { %s4574_s18 = sshll.u32 (!%p5199_p11), %s5129_s22, 4 }
 0x133   : > { %3946 = dma.done.wait (%p5202_p7), %s701_s20, 256  }
 0x134   : > { %3948 = vsyncadd (%p5202_p7), %s701_s20, 4294967040  ;;  %s710_s19 = scalar_lea.sflag [#allocation6], %s700_s9 }
 0x135   : > { %3950 = dma.done.wait (%p5202_p7), %s710_s19, 256  }
 0x136   : > { %3952 = vsyncadd (%p5202_p7), %s710_s19, 4294967040  ;;  %p5203_p3 = scmp.eq.s32.totalorder %s4189_s17, 0 }
 0x138   : > { %3954 = dma.done.wait (%p5203_p3), [#allocation6], 16   ;;  %p5204_p9 = pmov %p5203_p3 }
 0x139   : > { %p5205_p5 = pmov %p5203_p3 }
 0x13a   : > { %3956 = vsyncadd (%p5204_p9), [#allocation6], 4294967280 }
 0x13b   : > { %3958 = dma.done.wait (%p5205_p5), [#allocation9], 16   ;;  %p5206_p12 = pmov %p5203_p3 }
 0x13c   : > { %s5207_s21 = sld [smem:[#allocation24_spill]]  ;;  %s5208_s1 = sld [smem:[#allocation33_spill]] }
 0x13d   : > { %3960 = vsyncadd (%p5206_p12), [#allocation9], 4294967280 }
 0x142   : > { %s728_s4 = sand.u32 1, %s5207_s21   ;;  %p5209_p2 = scmp.ne.s32.totalorder %s5208_s1, 0 }
 0x143   : > { %s3276_s13 = smul.u32 192, %s728_s4 }
 0x145   : > { %s4595_s28 = scalar_lea.vmem [#allocation10], %s3276_s13 }
 0x146   : > { %3962 = dma.done.wait (%p5209_p2), %s701_s20, 3072  }
 0x147   : > { %3964 = vsyncadd (%p5209_p2), %s701_s20, 4294964224  ;;  %s2979_s16 = sshll.u32 %s728_s4, 6 }
 0x148   : > { %s4601_s6 = scalar_lea.vmem [#allocation11], %s2979_s16 }
 0x149   : > { %3966 = dma.done.wait (%p5209_p2), %s710_s19, 1024  }
 0x14a   : > { %3968 = vsyncadd (%p5209_p2), %s710_s19, 4294966272  ;;  %s2980_s17 = sshll.u32 %s728_s4, 8 }
 0x14b   : > { %s4607_s30 = scalar_lea.vmem [#allocation12], %s2980_s17 }
 0x14c   : > { %3970 = dma.done.wait (%p5209_p2), %s701_s20, 4096  }
 0x14d   : > { %3972 = vsyncadd (%p5209_p2), %s701_s20, 4294963200  ;;  %s4613_s25 = scalar_lea.vmem [#allocation13], %s2980_s17 }
 0x14e   : > { %3974 = dma.done.wait (%p5209_p2), %s710_s19, 4096  }
 0x14f   : > { %3976 = vsyncadd (%p5209_p2), %s710_s19, 4294963200  ;;  %s5210_s11 = sld [smem:[#allocation28_spill]]  ;;  %s5211_s9 = sld [smem:[#allocation47_spill]] }
 0x150   : > { %s5214_s3 = sld [smem:[#allocation45_spill]]  ;;  %s5215_s26 = sld [smem:[#allocation51_spill]] }
 0x151   : > { %s5217_s4 = sld [smem:[#allocation54_spill]]  ;;  %s5218_s22 = sld [smem:[#allocation55_spill]] }
 0x155   : > { %p857_p1 = scmp.lt.s32.totalorder %s5210_s11, 1  ;;  %p2984_p13 = scmp.ne.s32.totalorder %s5210_s11, 0 }
 0x156   : > { %v2985_v17 = vld [vmem:[#allocation7] ss:$0 sm:$0xff] (!%p2984_p13)  ;;  %v2986_v19 = vld [vmem:[#allocation8] ss:$0 sm:$0xff] (!%p2984_p13) }
 0x157   : > { %s4621_s14 = scalar_select %p857_p1, %s5210_s11, 1 }
 0x159   : > { %s3277_s15 = smul.u32 3, %s4621_s14  ;;  %s863_s20 = scalar_lea.vmem %s5211_s9, %s4621_s14 }
 0x15a   : > { %s2983_s12 = sshll.u32 %s4621_s14, 2  ;;  %s5216_s9 = sld [smem:[#allocation53_spill]] }
 0x15b   : > { %s4639_s10 = scalar_lea.vmem %s5214_s3, %s3277_s15  ;;  %s4645_s5 = scalar_lea.vmem %s5215_s26, %s2983_s12 }
 0x15c   : > { %s879_s13 = scalar_lea.vmem %s5217_s4, %s4621_s14  ;;  %s882_s24 = scalar_lea.vmem %s5218_s22, %s4621_s14 }
 0x15d   : > { %s4660_s3 = scalar_lea.vmem [#allocation14], %s4574_s18  ;;  %887 = sbr.rel (%p2984_p13) target bundleno = 668 (0x29c), region = 120 }
 0x15e   : > { %s5219_s12 = scalar_lea.vmem (!%p2984_p13), [#allocation2], %s4574_s18 }
 0x15f   : > { %v888_v0 = vld [vmem:[%s5219_s12] sm:$0xff] (!%p2984_p13)  ;;  %s5220_s26 = smov (!%p2984_p13), %s5219_s12 }
 0x160   : > { %s876_s19 = scalar_lea.vmem %s5216_s9, %s4621_s14  ;;  %892 = vadd.xlane.f32.xlu0 (!%p2984_p13), %v888_v0  ;;  %v889_v1 = vld [vmem:[%s5220_s26 + $0x8] sm:$0xff] (!%p2984_p13) }
 0x164   : > { %894 = vadd.xlane.f32.xlu0 %v889_v1 }
 0x1ed   : > { %v893_v2 = vpop.xlane.xlu0 %892 }
 0x1ee   : > { %v897_v3 = vmul.f32 0.0078125, %v893_v2 }
 0x1f0   : > { %v899_v4 = vsub.f32 %v888_v0, %v897_v3 }
 0x1f1   : > { %v895_v5 = vpop.xlane.xlu0 %894 }
 0x1f2   : > { %v898_v6 = vmul.f32 0.0078125, %v895_v5  ;;  %v901_v7 = vmul.f32 %v899_v4, %v899_v4 }
 0x1f4   : > { %v900_v8 = vsub.f32 %v889_v1, %v898_v6  ;;  %903 = vadd.xlane.f32.xlu1 %v901_v7 }
 0x1f6   : > { %v902_v9 = vmul.f32 %v900_v8, %v900_v8 }
 0x1f8   : > { %905 = vadd.xlane.f32.xlu1 %v902_v9 }
 0x281   : > { %v904_v10 = vpop.xlane.xlu1 %903 }
 0x282   : > { %v907_v11 = vmul.f32 0.0078125, %v904_v10 }
 0x284   : > { %v909_v12 = vadd.f32 1e-12, %v907_v11 }
 0x285   : > { %v906_v13 = vpop.xlane.xlu1 %905 }
 0x286   : > { %3442 = vrsqrt.f32 %v909_v12  ;;  %v908_v14 = vmul.f32 0.0078125, %v906_v13 }
 0x288   : > { %v910_v15 = vadd.f32 1e-12, %v908_v14 }
 0x28a   : > { %3444 = vrsqrt.f32 %v910_v15 }
 0x290   : > { %v3443_v16 = vpop.eup %3442 }
 0x291   : > { %v913_v18 = vmul.f32 %v3443_v16, %v899_v4 }
 0x293   : > { %v921_v20 = vmul.f32 %v2985_v17, %v913_v18 }
 0x294   : > { %v3445_v21 = vpop.eup %3444 }
 0x295   : > { %v929_v22 = vadd.f32 %v2986_v19, %v921_v20  ;;  %v914_v23 = vmul.f32 %v3445_v21, %v900_v8 }
 0x297   : > { %931 = vst [vmem:[%s4660_s3] sm:$0xff] %v929_v22  ;;  %v922_v24 = vmul.f32 %v2985_v17, %v914_v23 }
 0x299   : > { %v930_v25 = vadd.f32 %v2986_v19, %v922_v24 }
 0x29b   : > { %932 = vst [vmem:[%s4660_s3 + $0x8] sm:$0xff] %v930_v25 }
 0x29c PF: > { %v3461_v26 = vld [vmem:[%s4595_s28 + $0x4] ss:$12 sps:$4 sm:$0xff]   ;;  %v3463_v27 = vld [vmem:[%s4595_s28] ss:$12 sps:$4 sm:$0xff]   ;;  %v4041_v28 = vmov 0   ;;  %v4042_v29 = vmov 0.0   ;;  %v972_v55 = vlaneseq }
 0x29d   : > { %1147 = vmatprep.mubr.bf16.mxu0 %v4041_v28  ;;  %3186 = vmatprep.subr.bf16.mxu1 %v4042_v29  ;;  %v3464_v30 = vld [vmem:[%s4595_s28 + $0x1c] ss:$12 sps:$4 sm:$0xff]   ;;  %v3466_v31 = vld [vmem:[%s4595_s28 + $0x18] ss:$12 sps:$4 sm:$0xff]   ;;  %v3467_v32 = vld [vmem:[%s4595_s28 + $0x34] ss:$12 sps:$4 sm:$0xff]  }
 0x29e   : > { %1115 = vmatprep.subr.bf16.mxu0 %v3461_v26  ;;  %v3469_v33 = vld [vmem:[%s4595_s28 + $0x30] ss:$12 sps:$4 sm:$0xff]   ;;  %v3470_v34 = vld [vmem:[%s4595_s28 + $0x4c] ss:$12 sps:$4 sm:$0xff]   ;;  %v3472_v35 = vld [vmem:[%s4595_s28 + $0x48] ss:$12 sps:$4 sm:$0xff]  }
 0x29f   : > { %1116 = vmatpush1.bf16.msra.mxu0 %v3463_v27  ;;  %v3473_v36 = vld [vmem:[%s4595_s28 + $0x64] ss:$12 sps:$4 sm:$0xff]   ;;  %v3485_v37 = vld [vmem:[%s4595_s28 + $0x8] ss:$12 sps:$4 sm:$0xff]   ;;  %v3486_v38 = vld [vmem:[%s4595_s28 + $0x20] ss:$12 sps:$4 sm:$0xff]  }
 0x2a0   : > { %1117 = vmatprep.subr.bf16.mxu0 %v3464_v30  ;;  %3187 = vmatpush3.bf16.msra.mxu1 %v3485_v37  ;;  %v3475_v39 = vld [vmem:[%s4595_s28 + $0x60] ss:$12 sps:$4 sm:$0xff]   ;;  %v3476_v40 = vld [vmem:[%s4595_s28 + $0x7c] ss:$12 sps:$4 sm:$0xff]   ;;  %v3478_v41 = vld [vmem:[%s4595_s28 + $0x78] ss:$12 sps:$4 sm:$0xff]  }
 0x2a1   : > { %3188 = vmatprep.subr.bf16.mxu1 %v4042_v29  ;;  %v3479_v42 = vld [vmem:[%s4595_s28 + $0x94] ss:$12 sps:$4 sm:$0xff]   ;;  %v3487_v43 = vld [vmem:[%s4595_s28 + $0x38] ss:$12 sps:$4 sm:$0xff]   ;;  %v3488_v44 = vld [vmem:[%s4595_s28 + $0x50] ss:$12 sps:$4 sm:$0xff]  }
 0x2a2   : > { %v3481_v45 = vld [vmem:[%s4595_s28 + $0x90] ss:$12 sps:$4 sm:$0xff]   ;;  %v3482_v46 = vld [vmem:[%s4595_s28 + $0xac] ss:$12 sps:$4 sm:$0xff]   ;;  %v3489_v47 = vld [vmem:[%s4595_s28 + $0x68] ss:$12 sps:$4 sm:$0xff]  }
 0x2a3   : > { %1118 = vmatpush1.bf16.msra.mxu0 %v3466_v31  ;;  %v3484_v48 = vld [vmem:[%s4595_s28 + $0xa8] ss:$12 sps:$4 sm:$0xff]   ;;  %v3490_v51 = vld [vmem:[%s4595_s28 + $0x80] ss:$12 sps:$4 sm:$0xff]   ;;  %v3491_v53 = vld [vmem:[%s4595_s28 + $0x98] ss:$12 sps:$4 sm:$0xff]  }
 0x2a4   : > { %1119 = vmatprep.subr.bf16.mxu0 %v3467_v32  ;;  %3189 = vmatpush3.bf16.msra.mxu1 %v3486_v38  ;;  %v4696_v49 = vld [vmem:[%s4660_s3] sm:$0xff]  ;;  %v4699_v50 = vld [vmem:[%s4660_s3 + $0x8] sm:$0xff]  ;;  %vm4043_vm0 = vmmov 0   ;;  %v4718_v56 = vshrl.u32 %v972_v55, 7  ;;  %vm1202_vm1 = vcmask 261120   ;;  %vm1254_vm2 = vcmask 130048  }
 0x2a5   : > { %3190 = vmatprep.subr.bf16.mxu1 %v4042_v29  ;;  %v937_v52 = vpack.c.bf16 %v4699_v50, %v4696_v49  ;;  %v3492_v54 = vld [vmem:[%s4595_s28 + $0xb0] ss:$12 sps:$4 sm:$0xff]   ;;  %3202 = vmatprep.mubr.msk.bf16.mxu1 %vm4043_vm0, %v4042_v29  ;;  %s4044_s29 = smov 96   ;;  %s4045_s22 = smov 32   ;;  %vm1726_vm3 = vcmask 523264   ;;  %vm1729_vm4 = vcmask 785408  }
 0x2a6   : > { %v974_v57 = vsub.s32 0, %v4718_v56  ;;  %v970_v58 = vld [vmem:[%s4639_s10] sm:$0x7]  ;;  %v978_v59 = vsub.s32 1, %v4718_v56  ;;  %v982_v9 = vsub.s32 2, %v4718_v56  ;;  %s5221_s10 = scalar_lea.vmem [#allocation5], %s4574_s18 }
 0x2a7   : > { %1120 = vmatpush1.bf16.msra.mxu0 %v3469_v33  ;;  %v4741_v19 = vld [vmem:[%s5221_s10] sm:$0xff]  ;;  %s5222_s27 = smov %s5221_s10  ;;  %s4046_s18 = smov 64  }
 0x2a8   : > { %1121 = vmatprep.subr.bf16.mxu0 %v3470_v34  ;;  %3191 = vmatpush3.bf16.msra.mxu1 %v3487_v43  ;;  %v975_v60 = vrot.slane %v970_v58, %v974_v57  ;;  %v979_v62 = vrot.slane %v970_v58, %v978_v59  ;;  %v983_v10 = vrot.slane %v970_v58, %v982_v9  ;;  %v4745_v23 = vld [vmem:[%s5222_s27 + $0x8] sm:$0xff]  ;;  %s5224_s15 = sld [smem:[#allocation48_spill]]  ;;  %s5226_s7 = sld [smem:[#allocation49_spill]] }
 0x2a9   : > { %3192 = vmatprep.subr.bf16.mxu1 %v4042_v29  ;;  %s5231_s12 = sld [smem:[#allocation26_spill]]  ;;  %s4047_s11 = smov [#allocation14]  }
 0x2ab   : > { %1122 = vmatpush1.bf16.msra.mxu0 %v3472_v35 }
 0x2ac   : > { %1123 = vmatprep.subr.bf16.mxu0 %v3473_v36  ;;  %3193 = vmatpush3.bf16.msra.mxu1 %v3488_v44 }
 0x2ad   : > { %3194 = vmatprep.subr.bf16.mxu1 %v4042_v29 }
 0x2ae   : > { %s5227_s9 = scalar_lea.vmem %s5226_s7, %s4621_s14 }
 0x2af   : > { %1124 = vmatpush1.bf16.msra.mxu0 %v3475_v39 }
 0x2b0   : > { %1125 = vmatprep.subr.bf16.mxu0 %v3476_v40  ;;  %3195 = vmatpush3.bf16.msra.mxu1 %v3489_v47 }
 0x2b1   : > { %3196 = vmatprep.subr.bf16.mxu1 %v4042_v29 }
 0x2b3   : > { %1126 = vmatpush1.bf16.msra.mxu0 %v3478_v41 }
 0x2b4   : > { %1127 = vmatprep.subr.bf16.mxu0 %v3479_v42  ;;  %3197 = vmatpush3.bf16.msra.mxu1 %v3490_v51 }
 0x2b5   : > { %3198 = vmatprep.subr.bf16.mxu1 %v4042_v29 }
 0x2b7   : > { %1128 = vmatpush1.bf16.msra.mxu0 %v3481_v45 }
 0x2b8   : > { %1129 = vmatprep.subr.bf16.mxu0 %v3482_v46  ;;  %3199 = vmatpush3.bf16.msra.mxu1 %v3491_v53 }
 0x2b9   : > { %3200 = vmatprep.subr.bf16.mxu1 %v4042_v29 }
 0x2bb   : > { %1130 = vmatpush1.bf16.msra.mxu0 %v3484_v48 }
 0x2bc   : > { %3230 = vmatprep.subr.bf16.mxu0 %v4042_v29  ;;  %3201 = vmatpush3.bf16.msra.mxu1 %v3492_v54 }
 0x2bd   : > { %3206 = vmatprep.subr.bf16.mxu1 %v4042_v29 }
 0x2be   : > { %1148 = vmatmul.mubr.bf16.vlgmr.msra.gmra.mrb[0].mxu0 %v937_v52 }
 0x2bf   : > { %3232 = vmatprep.mubr.msk.bf16.mxu0 %vm4043_vm0, %v4042_v29  ;;  %3203 = vmatmul.mubr.bf16.vlgmr.msra.gmra.mrb[0].mxu1 %v937_v52 }
 0x2c0   : > { %3208 = vmatprep.mubr.msk.bf16.mxu1 %vm4043_vm0, %v4042_v29 }
 0x391   : > { %v1149_v61 = vpop.f32.mrb[0].mxu0 }
 0x392   : > { %v1151_v63 = vpop.f32.mrb[1].mxu0  ;;  %v1150_v1 = vadd.f32 %v1149_v61, %v975_v60  ;;  %v1192_v11 = vpop.f32.mrb[0].mxu1 }
 0x393   : > { %v1153_v0 = vpop.f32.mrb[2].mxu0  ;;  %v1152_v4 = vadd.f32 %v1151_v63, %v979_v62  ;;  %v1193_v12 = vadd.f32 %v1192_v11, %v983_v10  ;;  %v3204_v13 = vpop.f32.mrb[1].mxu1 }
 0x394   : > { %v1154_v2 = vadd.f32 %v1153_v0, %v975_v60  ;;  %v1155_v3 = vpop.f32.mrb[3].mxu0  ;;  %v1195_v14 = vpop.f32.mrb[2].mxu1 }
 0x395   : > { %v1156_v5 = vadd.f32 %v1155_v3, %v979_v62  ;;  %v1196_v15 = vadd.f32 %v1195_v14, %v983_v10  ;;  %v3205_v16 = vpop.f32.mrb[3].mxu1 }
 0x396   : > { %v1199_v6 = vpack.c.bf16 %v1154_v2, %v1150_v1 }
 0x397   : > { %v1200_v7 = vpack.c.bf16 %v1156_v5, %v1152_v4  ;;  %v4735_v17 = vpack.c.bf16 %v1196_v15, %v1193_v12 }
 0x399   : > { %v1207_v8 = vsel %vm1202_vm1, %v1200_v7, 0 }
 0x39a   : > { %3207 = vmatpush3.bf16.xpose.msra.mxu1 %v1207_v8 }
 0x39b   : > { %3212 = vmatprep.subr.bf16.mxu1 %v4042_v29 }
 0x3a1   : > { %3209 = vmatmul.mubr.msk.bf16.vlgmr.msra.gmra.mrb[4].mxu1 %vm1202_vm1, %v1199_v6 }
 0x3a2   : > { %3214 = vmatprep.mubr.msk.bf16.mxu1 %vm4043_vm0, %v4042_v29  ;;  %3213 = vmatpush3.bf16.msra.mxu1 %v4735_v17 }
 0x3a3   : > { %3218 = vmatprep.subr.bf16.mxu1 %v4042_v29 }
 0x474   : > { %v1243_v18 = vpop.f32.mrb[4].mxu1 }
 0x475   : > { %v1250_v20 = vmul.f32 0.17677669, %v1243_v18  ;;  %v3210_v21 = vpop.f32.mrb[5].mxu1 }
 0x476   : > { %v1246_v22 = vpop.f32.mrb[6].mxu1 }
 0x477   : > { %v1251_v24 = vmul.f32 0.17677669, %v1246_v22  ;;  %v3211_v25 = vpop.f32.mrb[7].mxu1  ;;  %v1252_v26 = vadd.f32 %v1250_v20, %v4741_v19 }
 0x479   : > { %v1255_v27 = vsel %vm1254_vm2, %v1252_v26, -inf  ;;  %v1253_v30 = vadd.f32 %v1251_v24, %v4745_v23 }
 0x47a   : > { %1256 = vmax.xlane.f32.xlu0 %v1255_v27 }
 0x47b   : > { %v1258_v31 = vsel %vm1254_vm2, %v1253_v30, -inf }
 0x47e   : > { %1259 = vmax.xlane.f32.xlu0 %v1258_v31 }
 0x494   : > { %1326 = vrot.lane.b32.xlu0 %v1200_v7, %s4044_s29 }
 0x498   : > { %1577 = vrot.lane.b32.xlu0 %v1200_v7, %s4045_s22 }
 0x507   : > { %v1257_v32 = vpop.xlane.xlu0 %1256 }
 0x508   : > { %v1261_v33 = vsub.f32 %v1252_v26, %v1257_v32 }
 0x50a   : > { %v1263_v34 = vmul.f32 1.442695, %v1261_v33 }
 0x50b   : > { %v1260_v35 = vpop.xlane.xlu0 %1259 }
 0x50c   : > { %3581 = vpow2.f32 %v1263_v34  ;;  %v1262_v36 = vsub.f32 %v1253_v30, %v1260_v35 }
 0x50e   : > { %v1265_v37 = vmul.f32 1.442695, %v1262_v36 }
 0x50f   : > { %v1327_v45 = vpop.permute.xlu0 %1326 }
 0x510   : > { %3583 = vpow2.f32 %v1265_v37  ;;  %v1332_v58 = vsel %vm1202_vm1, %v1327_v45, 0 }
 0x513   : > { %v1578_v54 = vpop.permute.xlu0 %1577 }
 0x514   : > { %v1583_v61 = vsel %vm1202_vm1, %v1578_v54, 0 }
 0x516   : > { %v3582_v38 = vpop.eup %3581 }
 0x517   : > { %v1267_v39 = vsel %vm1254_vm2, %v3582_v38, 0.0 }
 0x518   : > { %1268 = vadd.xlane.f32.xlu1 %v1267_v39 }
 0x51a   : > { %v3584_v40 = vpop.eup %3583 }
 0x51b   : > { %v1270_v41 = vsel %vm1254_vm2, %v3584_v40, 0.0 }
 0x51c   : > { %1271 = vadd.xlane.f32.xlu1 %v1270_v41 }
 0x52d   : > { %1323 = vrot.lane.b32.xlu1 %v1199_v6, %s4044_s29 }
 0x531   : > { %1452 = vrot.lane.b32.xlu1 %v1200_v7, %s4046_s18 }
 0x535   : > { %1450 = vrot.lane.b32.xlu1 %v1199_v6, %s4046_s18 }
 0x539   : > { %1575 = vrot.lane.b32.xlu1 %v1199_v6, %s4045_s22 }
 0x5a5   : > { %v1269_v42 = vpop.xlane.xlu1 %1268 }
 0x5a6   : > { %3585 = vrcp.f32 %v1269_v42 }
 0x5a9   : > { %v1272_v43 = vpop.xlane.xlu1 %1271 }
 0x5aa   : > { %3587 = vrcp.f32 %v1272_v43 }
 0x5ad   : > { %v1324_v44 = vpop.permute.xlu1 %1323 }
 0x5b0   : > { %v3586_v47 = vpop.eup %3585 }
 0x5b1   : > { %v1453_v46 = vpop.permute.xlu1 %1452  ;;  %v1274_v52 = vmul.f32 %v3586_v47, %v3582_v38 }
 0x5b2   : > { %v1458_v48 = vsel %vm1202_vm1, %v1453_v46, 0 }
 0x5b3   : > { %3231 = vmatpush3.bf16.xpose.msra.mxu0 %v1458_v48 }
 0x5b4   : > { %v3588_v51 = vpop.eup %3587  ;;  %3242 = vmatprep.subr.bf16.mxu0 %v4042_v29 }
 0x5b5   : > { %v1276_v53 = vmul.f32 %v3588_v51, %v3584_v40  ;;  %v1451_v60 = vpop.permute.xlu1 %1450 }
 0x5b7   : > { %v1277_v55 = vpack.c.bf16 %v1276_v53, %v1274_v52 }
 0x5b9   : > { %3215 = vmatmul.mubr.msk.bf16.vlgmr.msra.gmra.mrb[8].mxu1 %vm1254_vm2, %v1277_v55  ;;  %v1576_v62 = vpop.permute.xlu1 %1575 }
 0x5ba   : > { %3219 = vmatpush3.bf16.xpose.msra.mxu1 %v1332_v58  ;;  %3233 = vmatmul.mubr.msk.bf16.vlgmr.msra.gmra.mrb[4].mxu0 %vm1202_vm1, %v1451_v60 }
 0x5bb   : > { %3243 = vmatpush3.bf16.xpose.msra.mxu0 %v1583_v61  ;;  %3220 = vmatprep.mubr.msk.bf16.mxu1 %vm4043_vm0, %v4042_v29 }
 0x5bc   : > { %3244 = vmatprep.mubr.msk.bf16.mxu0 %vm4043_vm0, %v4042_v29  ;;  %3224 = vmatprep.subr.bf16.mxu1 %v4042_v29 }
 0x5bd   : > { %3254 = vmatprep.subr.bf16.mxu0 %v4042_v29 }
 0x5c1   : > { %3221 = vmatmul.mubr.msk.bf16.vlgmr.msra.gmra.mrb[12].mxu1 %vm1202_vm1, %v1324_v44 }
 0x5c2   : > { %3245 = vmatmul.mubr.msk.bf16.vlgmr.msra.gmra.mrb[8].mxu0 %vm1202_vm1, %v1576_v62  ;;  %3226 = vmatprep.mubr.msk.bf16.mxu1 %vm4043_vm0, %v4042_v29 }
 0x5c3   : > { %3270 = vmatprep.mubr.msk.bf16.mxu0 %vm4043_vm0, %v4042_v29 }
 0x68c   : > { %v4777_v63 = vpop.f32.mrb[8].mxu1 }
 0x68d   : > { %v3216_v0 = vpop.f32.mrb[9].mxu1  ;;  %v1494_v1 = vpop.f32.mrb[4].mxu0 }
 0x68e   : > { %v4779_v2 = vpop.f32.mrb[10].mxu1  ;;  %v3234_v3 = vpop.f32.mrb[5].mxu0  ;;  %v1501_v8 = vmul.f32 0.17677669, %v1494_v1 }
 0x68f   : > { %v3217_v4 = vpop.f32.mrb[11].mxu1  ;;  %v1497_v5 = vpop.f32.mrb[6].mxu0 }
 0x690   : > { %v3235_v6 = vpop.f32.mrb[7].mxu0  ;;  %v1502_v24 = vmul.f32 0.17677669, %v1497_v5  ;;  %v1503_v27 = vadd.f32 %v1501_v8, %v4741_v19 }
 0x692   : > { %v1505_v33 = vsel %vm1254_vm2, %v1503_v27, -inf  ;;  %v1504_v34 = vadd.f32 %v1502_v24, %v4745_v23 }
 0x694   : > { %v1368_v7 = vpop.f32.mrb[12].mxu1  ;;  %v1508_v36 = vsel %vm1254_vm2, %v1504_v34, -inf }
 0x695   : > { %v1375_v10 = vmul.f32 0.17677669, %v1368_v7  ;;  %v3222_v11 = vpop.f32.mrb[13].mxu1  ;;  %v1619_v12 = vpop.f32.mrb[8].mxu0 }
 0x696   : > { %v1371_v13 = vpop.f32.mrb[14].mxu1  ;;  %v3246_v14 = vpop.f32.mrb[9].mxu0  ;;  %v1626_v32 = vmul.f32 0.17677669, %v1619_v12 }
 0x697   : > { %v1376_v15 = vmul.f32 0.17677669, %v1371_v13  ;;  %v3223_v16 = vpop.f32.mrb[15].mxu1  ;;  %v1622_v18 = vpop.f32.mrb[10].mxu0  ;;  %v1377_v20 = vadd.f32 %v1375_v10, %v4741_v19 }
 0x698   : > { %v1627_v21 = vmul.f32 0.17677669, %v1622_v18  ;;  %v3247_v22 = vpop.f32.mrb[11].mxu0  ;;  %v1628_v37 = vadd.f32 %v1626_v32, %v4741_v19 }
 0x699   : > { %v1379_v25 = vsel %vm1254_vm2, %v1377_v20, -inf  ;;  %v1378_v26 = vadd.f32 %v1376_v15, %v4745_v23 }
 0x69a   : > { %1380 = vmax.xlane.f32.xlu0 %v1379_v25  ;;  %v1629_v31 = vadd.f32 %v1627_v21, %v4745_v23  ;;  %v1630_v38 = vsel %vm1254_vm2, %v1628_v37, -inf }
 0x69b   : > { %v1382_v30 = vsel %vm1254_vm2, %v1378_v26, -inf }
 0x69c   : > { %1383 = vmax.xlane.f32.xlu1 %v1382_v30  ;;  %v1633_v35 = vsel %vm1254_vm2, %v1629_v31, -inf }
 0x69e   : > { %1506 = vmax.xlane.f32.xlu0 %v1505_v33 }
 0x6a0   : > { %1634 = vmax.xlane.f32.xlu1 %v1633_v35 }
 0x6a2   : > { %1509 = vmax.xlane.f32.xlu0 %v1508_v36 }
 0x6a6   : > { %1631 = vmax.xlane.f32.xlu0 %v1630_v38 }
 0x727   : > { %v1381_v39 = vpop.xlane.xlu0 %1380 }
 0x728   : > { %v1385_v47 = vsub.f32 %v1377_v20, %v1381_v39  ;;  %v3493_v39 = vld [vmem:[%s4601_s6] sm:$0xff]  }
 0x729   : > { %v1384_v40 = vpop.xlane.xlu1 %1383  ;;  %3255 = vmatpush3.bf16.msra.mxu0 %v3493_v39 }
 0x72a   : > { %v1386_v48 = vsub.f32 %v1378_v26, %v1384_v40  ;;  %v1387_v54 = vmul.f32 1.442695, %v1385_v47  ;;  %v3494_v40 = vld [vmem:[%s4601_s6 + $0x8] sm:$0xff]   ;;  %3256 = vmatprep.subr.bf16.mxu0 %v4042_v29 }
 0x72b   : > { %v1507_v41 = vpop.xlane.xlu0 %1506 }
 0x72c   : > { %v1511_v42 = vsub.f32 %v1503_v27, %v1507_v41  ;;  %v1389_v55 = vmul.f32 1.442695, %v1386_v48  ;;  %v3495_v41 = vld [vmem:[%s4601_s6 + $0x10] sm:$0xff]  }
 0x72d   : > { %v1635_v43 = vpop.xlane.xlu1 %1634  ;;  %3257 = vmatpush3.bf16.msra.mxu0 %v3494_v40 }
 0x72e   : > { %v1513_v44 = vmul.f32 1.442695, %v1511_v42  ;;  %v1637_v45 = vsub.f32 %v1629_v31, %v1635_v43  ;;  %3258 = vmatprep.subr.bf16.mxu0 %v4042_v29  ;;  %v3496_v42 = vld [vmem:[%s4601_s6 + $0x18] sm:$0xff]   ;;  %v3497_v43 = vld [vmem:[%s4601_s6 + $0x20] sm:$0xff]  }
 0x72f   : > { %v1510_v23 = vpop.xlane.xlu0 %1509 }
 0x730   : > { %3589 = vpow2.f32 %v1513_v44  ;;  %v1512_v46 = vsub.f32 %v1504_v34, %v1510_v23  ;;  %v1640_v51 = vmul.f32 1.442695, %v1637_v45  ;;  %v3498_v23 = vld [vmem:[%s4601_s6 + $0x28] sm:$0xff]  }
 0x731   : > { %3259 = vmatpush3.bf16.msra.mxu0 %v3495_v41 }
 0x732   : > { %v1515_v52 = vmul.f32 1.442695, %v1512_v46  ;;  %3260 = vmatprep.subr.bf16.mxu0 %v4042_v29 }
 0x733   : > { %v1632_v53 = vpop.xlane.xlu0 %1631 }
 0x734   : > { %3591 = vpow2.f32 %v1515_v52  ;;  %v1636_v19 = vsub.f32 %v1628_v37, %v1632_v53 }
 0x735   : > { %3593 = vpow2.f32 %v1640_v51  ;;  %3261 = vmatpush3.bf16.msra.mxu0 %v3496_v42  ;;  %v3499_v51 = vld [vmem:[%s4601_s6 + $0x30] sm:$0xff]  }
 0x736   : > { %v1638_v58 = vmul.f32 1.442695, %v1636_v19  ;;  %3262 = vmatprep.subr.bf16.mxu0 %v4042_v29  ;;  %v3500_v19 = vld [vmem:[%s4601_s6 + $0x38] sm:$0xff]   ;;  %s5234_s6 = sld [smem:[#allocation56_spill]] }
 0x738   : > { %3595 = vpow2.f32 %v1638_v58 }
 0x739   : > { %3597 = vpow2.f32 %v1387_v54  ;;  %3263 = vmatpush3.bf16.msra.mxu0 %v3497_v43  ;;  %v3515_v43 = vld [vmem:[%s4607_s30 + $0x44] ss:$16 sps:$4 sm:$0xff]  }
 0x73a   : > { %v3590_v60 = vpop.eup %3589  ;;  %3599 = vpow2.f32 %v1389_v55  ;;  %3264 = vmatprep.subr.bf16.mxu0 %v4042_v29 }
 0x73b   : > { %v1517_v61 = vsel %vm1254_vm2, %v3590_v60, 0.0 }
 0x73c   : > { %1518 = vadd.xlane.f32.xlu0 %v1517_v61 }
 0x73d   : > { %3265 = vmatpush3.bf16.msra.mxu0 %v3498_v23  ;;  %v3516_v23 = vld [vmem:[%s4607_s30 + $0x48] ss:$16 sps:$4 sm:$0xff]  }
 0x73e   : > { %v3592_v62 = vpop.eup %3591  ;;  %3266 = vmatprep.subr.bf16.mxu0 %v4042_v29 }
 0x73f   : > { %v1520_v0 = vsel %vm1254_vm2, %v3592_v62, 0.0  ;;  %v3594_v1 = vpop.eup %3593 }
 0x740   : > { %1521 = vadd.xlane.f32.xlu1 %v1520_v0  ;;  %v1645_v6 = vsel %vm1254_vm2, %v3594_v1, 0.0 }
 0x741   : > { %3267 = vmatpush3.bf16.msra.mxu0 %v3499_v51  ;;  %v3522_v51 = vld [vmem:[%s4607_s30 + $0x68] ss:$16 sps:$4 sm:$0xff]  }
 0x742   : > { %v3596_v3 = vpop.eup %3595  ;;  %3268 = vmatprep.subr.bf16.mxu0 %v4042_v29 }
 0x743   : > { %v3598_v4 = vpop.eup %3597  ;;  %v1642_v5 = vsel %vm1254_vm2, %v3596_v3, 0.0 }
 0x744   : > { %v3600_v7 = vpop.eup %3599  ;;  %1643 = vadd.xlane.f32.xlu0 %v1642_v5  ;;  %1646 = vadd.xlane.f32.xlu1 %v1645_v6  ;;  %v1391_v8 = vsel %vm1254_vm2, %v3598_v4, 0.0 }
 0x745   : > { %v1394_v10 = vsel %vm1254_vm2, %v3600_v7, 0.0  ;;  %3269 = vmatpush3.bf16.msra.mxu0 %v3500_v19  ;;  %v3525_v19 = vld [vmem:[%s4607_s30 + $0x80] ss:$16 sps:$4 sm:$0xff]  }
 0x748   : > { %1392 = vadd.xlane.f32.xlu0 %v1391_v8  ;;  %1395 = vadd.xlane.f32.xlu1 %v1394_v10 }
 0x759   : > { %1528 = vrot.lane.b32.xlu1 %v4735_v17, %s4046_s18 }
 0x75d   : > { %1653 = vrot.lane.b32.xlu1 %v4735_v17, %s4045_s22 }
 0x75e   : > { %1403 = vrot.lane.b32.xlu0 %v4735_v17, %s4044_s29 }
 0x7c9   : > { %v1519_v11 = vpop.xlane.xlu0 %1518 }
 0x7cd   : > { %v1522_v12 = vpop.xlane.xlu1 %1521 }
 0x7d1   : > { %v1644_v13 = vpop.xlane.xlu0 %1643  ;;  %v1647_v14 = vpop.xlane.xlu1 %1646 }
 0x7d5   : > { %v1393_v15 = vpop.xlane.xlu0 %1392  ;;  %v1396_v16 = vpop.xlane.xlu1 %1395 }
 0x7d6   : > { %3601 = vrcp.f32 %v1393_v15 }
 0x7d7   : > { %3603 = vrcp.f32 %v1396_v16 }
 0x7d8   : > { %3605 = vrcp.f32 %v1522_v12 }
 0x7d9   : > { %v1404_v18 = vpop.permute.xlu0 %1403  ;;  %3607 = vrcp.f32 %v1519_v11  ;;  %v1529_v26 = vpop.permute.xlu1 %1528 }
 0x7da   : > { %3225 = vmatpush3.bf16.msra.mxu1 %v1404_v18  ;;  %3609 = vrcp.f32 %v1644_v13 }
 0x7db   : > { %3236 = vmatprep.subr.bf16.mxu1 %v4042_v29  ;;  %3611 = vrcp.f32 %v1647_v14 }
 0x7dd   : > { %v1654_v35 = vpop.permute.xlu1 %1653 }
 0x7e0   : > { %v3602_v20 = vpop.eup %3601 }
 0x7e1   : > { %v3604_v21 = vpop.eup %3603  ;;  %v1398_v22 = vmul.f32 %v3602_v20, %v3598_v4 }
 0x7e2   : > { %v1400_v24 = vmul.f32 %v3604_v21, %v3600_v7  ;;  %v3606_v25 = vpop.eup %3605 }
 0x7e3   : > { %v3608_v27 = vpop.eup %3607  ;;  %v1526_v30 = vmul.f32 %v3606_v25, %v3592_v62 }
 0x7e4   : > { %v1401_v17 = vpack.c.bf16 %v1400_v24, %v1398_v22  ;;  %v1524_v31 = vmul.f32 %v3608_v27, %v3590_v60  ;;  %v3610_v32 = vpop.eup %3609  ;;  %v3501_v27 = vld [vmem:[%s4607_s30] ss:$16 sps:$4 sm:$0xff]  }
 0x7e5   : > { %v3612_v34 = vpop.eup %3611  ;;  %v1649_v36 = vmul.f32 %v3610_v32, %v3596_v3  ;;  %v3506_v32 = vld [vmem:[%s4607_s30 + $0xc] ss:$16 sps:$4 sm:$0xff]  }
 0x7e6   : > { %3227 = vmatmul.mubr.msk.bf16.vlgmr.msra.gmra.mrb[16].mxu1 %vm1254_vm2, %v1401_v17  ;;  %v1527_v33 = vpack.c.bf16 %v1526_v30, %v1524_v31  ;;  %v1651_v37 = vmul.f32 %v3612_v34, %v3594_v1  ;;  %v3503_v30 = vld [vmem:[%s4607_s30 + $0x4] ss:$16 sps:$4 sm:$0xff]   ;;  %v3504_v31 = vld [vmem:[%s4607_s30 + $0x8] ss:$16 sps:$4 sm:$0xff]   ;;  %v3512_v34 = vld [vmem:[%s4607_s30 + $0x2c] ss:$16 sps:$4 sm:$0xff]   ;;  %2146 = vmatprep.subr.bf16.mxu0 %v3506_v32 }
 0x7e7   : > { %3237 = vmatpush3.bf16.msra.mxu1 %v1529_v26  ;;  %3238 = vmatprep.mubr.msk.bf16.mxu1 %vm4043_vm0, %v4042_v29  ;;  %v3555_v32 = vld [vmem:[%s4613_s25 + $0x8] sm:$0xff]  }
 0x7e8   : > { %3248 = vmatprep.subr.bf16.mxu1 %v4042_v29  ;;  %v1652_v38 = vpack.c.bf16 %v1651_v37, %v1649_v36 }
 0x7ee   : > { %3239 = vmatmul.mubr.msk.bf16.vlgmr.msra.gmra.mrb[20].mxu1 %vm1254_vm2, %v1527_v33  ;;  %v3509_v33 = vld [vmem:[%s4607_s30 + $0x24] ss:$16 sps:$4 sm:$0xff]  }
 0x7ef   : > { %3249 = vmatpush3.bf16.msra.mxu1 %v1654_v35  ;;  %3250 = vmatprep.mubr.msk.bf16.mxu1 %vm4043_vm0, %v4042_v29  ;;  %v3507_v35 = vld [vmem:[%s4607_s30 + $0x20] ss:$16 sps:$4 sm:$0xff]  }
 0x7f0   : > { %2103 = vmatprep.subr.bf16.mxu1 %v3503_v30  ;;  %v3553_v30 = vld [vmem:[%s4613_s25 + $0x48] sm:$0xff]  }
 0x7f6   : > { %3251 = vmatmul.mubr.msk.bf16.vlgmr.msra.gmra.mrb[24].mxu1 %vm1254_vm2, %v1652_v38 }
 0x7f7   : > { %2135 = vmatprep.mubr.bf16.mxu1 %v4041_v28  ;;  %2104 = vmatpush1.bf16.msra.mxu1 %v3501_v27  ;;  %v3552_v27 = vld [vmem:[%s4613_s25 + $0x80] sm:$0xff]  }
 0x7f8   : > { %2105 = vmatprep.subr.bf16.mxu1 %v3509_v33  ;;  %v3556_v33 = vld [vmem:[%s4613_s25 + $0x88] sm:$0xff]  }
 0x7fb   : > { %2106 = vmatpush1.bf16.msra.mxu1 %v3507_v35  ;;  %v3558_v35 = vld [vmem:[%s4613_s25 + $0xd0] sm:$0xff]  }
 0x7fc   : > { %2107 = vmatprep.subr.bf16.mxu1 %v3515_v43  ;;  %v3568_v43 = vld [vmem:[%s4613_s25 + $0xa0] sm:$0xff]  }
 0x8b9   : > { %v1443_v44 = vpop.f32.mrb[16].mxu1 }
 0x8ba   : > { %v3228_v45 = vpop.f32.mrb[17].mxu1 }
 0x8bb   : > { %v1446_v46 = vpop.f32.mrb[18].mxu1  ;;  %v3513_v45 = vld [vmem:[%s4607_s30 + $0x40] ss:$16 sps:$4 sm:$0xff]  }
 0x8bc   : > { %v3446_v47 = vpack.i.bf16 %v1446_v46, %v1443_v44  ;;  %v3229_v48 = vpop.f32.mrb[19].mxu1  ;;  %v3518_v44 = vld [vmem:[%s4607_s30 + $0x4c] ss:$16 sps:$4 sm:$0xff]   ;;  %2108 = vmatpush1.bf16.msra.mxu1 %v3513_v45  ;;  %v3521_v46 = vld [vmem:[%s4607_s30 + $0x64] ss:$16 sps:$4 sm:$0xff]  }
 0x8bd   : > { %v3519_v48 = vld [vmem:[%s4607_s30 + $0x60] ss:$16 sps:$4 sm:$0xff]   ;;  %2109 = vmatprep.subr.bf16.mxu1 %v3521_v46  ;;  %v3570_v45 = vld [vmem:[%s4613_s25 + $0xe8] sm:$0xff]  }
 0x8be   : > { %3447 = vrot.lane.b32.xlu1 %v3446_v47, %s4045_s22  ;;  %v3524_v47 = vld [vmem:[%s4607_s30 + $0x6c] ss:$16 sps:$4 sm:$0xff]  }
 0x8bf   : > { %v3572_v46 = vld [vmem:[%s4613_s25 + $0xa8] sm:$0xff]  }
 0x8c0   : > { %2110 = vmatpush1.bf16.msra.mxu1 %v3519_v48  ;;  %v3574_v48 = vld [vmem:[%s4613_s25 + $0xf0] sm:$0xff]  }
 0x8c1   : > { %v1568_v52 = vpop.f32.mrb[20].mxu1 }
 0x8c2   : > { %v3240_v53 = vpop.f32.mrb[21].mxu1 }
 0x8c3   : > { %v1571_v54 = vpop.f32.mrb[22].mxu1  ;;  %v3530_v53 = vld [vmem:[%s4607_s30 + $0x8c] ss:$16 sps:$4 sm:$0xff]  }
 0x8c4   : > { %v3451_v55 = vpack.i.bf16 %v1571_v54, %v1568_v52  ;;  %v3241_v58 = vpop.f32.mrb[23].mxu1  ;;  %v3527_v52 = vld [vmem:[%s4607_s30 + $0x84] ss:$16 sps:$4 sm:$0xff]   ;;  %v3528_v54 = vld [vmem:[%s4607_s30 + $0x88] ss:$16 sps:$4 sm:$0xff]  }
 0x8c5   : > { %2111 = vmatprep.subr.bf16.mxu1 %v3527_v52  ;;  %v3536_v58 = vld [vmem:[%s4607_s30 + $0xac] ss:$16 sps:$4 sm:$0xff]   ;;  %v3576_v52 = vld [vmem:[%s4613_s25 + $0xb0] sm:$0xff]  }
 0x8c6   : > { %3452 = vrot.lane.b32.xlu0 %v3451_v55, %s4046_s18  ;;  %2112 = vmatpush1.bf16.msra.mxu1 %v3525_v19  ;;  %v3533_v55 = vld [vmem:[%s4607_s30 + $0xa4] ss:$16 sps:$4 sm:$0xff]   ;;  %v3578_v19 = vld [vmem:[%s4613_s25 + $0xf8] sm:$0xff]   ;;  %s2668_s18 = sshll.u32 %s4660_s3, 4  ;;  %s5009_s18 = int_to_ptr.vmem [resolvable:$true] %s2668_s18 }
 0x8c7   : > { %2113 = vmatprep.subr.bf16.mxu1 %v3533_v55  ;;  %v3580_v55 = vld [vmem:[%s4613_s25 + $0xb8] sm:$0xff]  }
 0x8c9   : > { %v1693_v60 = vpop.f32.mrb[24].mxu1 }
 0x8ca   : > { %v3252_v61 = vpop.f32.mrb[25].mxu1 }
 0x8cb   : > { %v1696_v62 = vpop.f32.mrb[26].mxu1  ;;  %v3534_v61 = vld [vmem:[%s4607_s30 + $0xa8] ss:$16 sps:$4 sm:$0xff]  }
 0x8cc   : > { %v3456_v0 = vpack.i.bf16 %v1696_v62, %v1693_v60  ;;  %v3253_v1 = vpop.f32.mrb[27].mxu1  ;;  %v3531_v60 = vld [vmem:[%s4607_s30 + $0xa0] ss:$16 sps:$4 sm:$0xff]   ;;  %v3539_v62 = vld [vmem:[%s4607_s30 + $0xc4] ss:$16 sps:$4 sm:$0xff]  }
 0x8cd   : > { %2114 = vmatpush1.bf16.msra.mxu1 %v3531_v60  ;;  %v3537_v1 = vld [vmem:[%s4607_s30 + $0xc0] ss:$16 sps:$4 sm:$0xff]   ;;  %v1937_v60 = vsub.s32 3, %v4718_v56 }
 0x8ce   : > { %3457 = vrot.lane.b32.xlu1 %v3456_v0, %s4044_s29  ;;  %v3542_v0 = vld [vmem:[%s4607_s30 + $0xcc] ss:$16 sps:$4 sm:$0xff]   ;;  %2115 = vmatprep.subr.bf16.mxu1 %v3539_v62  ;;  %s5233_s29 = sld [smem:[#allocation36_spill]] }
 0x8d1   : > { %2116 = vmatpush1.bf16.msra.mxu1 %v3537_v1 }
 0x8d4   : > { %p5236_p4 = scmp.ne.s32.totalorder %s5233_s29, 0 }
 0x930   : > { %v3448_v3 = vpop.permute.xlu1 %3447 }
 0x931   : > { %v3450_v5 = vunpack.i.h.bf16 %v3448_v3  ;;  %v3449_v6 = vunpack.i.l.bf16 %v3448_v3  ;;  %v3540_v3 = vld [vmem:[%s4607_s30 + $0xc8] ss:$16 sps:$4 sm:$0xff]  }
 0x933   : > { %v1725_v10 = vsel %vm1202_vm1, %v4779_v2, %v3450_v5  ;;  %v1724_v11 = vsel %vm1202_vm1, %v4777_v63, %v3449_v6  ;;  %v3019_v63 = vld [vmem:[%s863_s20] ss:$0 sm:$0xff]  ;;  %v3543_v6 = vld [vmem:[%s4607_s30 + $0xe0] ss:$16 sps:$4 sm:$0xff]   ;;  %s5225_s20 = scalar_lea.vmem %s5224_s15, %s4621_s14  ;;  %s5235_s14 = sand.u32 1, %s5231_s12  }
 0x934   : > { %v3548_v5 = vld [vmem:[%s4607_s30 + $0xec] ss:$16 sps:$4 sm:$0xff]   ;;  %s3877_s15 = sshll.u32 %s4047_s11, 4  ;;  %s3878_s15 = int_to_ptr.vmem [resolvable:$false] %s3877_s15 }
 0x935   : > { %p3880_p10 = scmp.lt.s32.totalorder %s5009_s18, %s3878_s15 }
 0x938   : > { %v3453_v4 = vpop.permute.xlu0 %3452 }
 0x939   : > { %v3455_v29 = vunpack.i.h.bf16 %v3453_v4  ;;  %v3454_v7 = vunpack.i.l.bf16 %v3453_v4  ;;  %v3545_v4 = vld [vmem:[%s4607_s30 + $0xe4] ss:$16 sps:$4 sm:$0xff]  }
 0x93a   : > { %2117 = vmatprep.subr.bf16.mxu1 %v3545_v4 }
 0x93b   : > { %v1728_v14 = vsel %vm1726_vm3, %v1725_v10, %v3455_v29  ;;  %v1727_v15 = vsel %vm1726_vm3, %v1724_v11, %v3454_v7  ;;  %v3546_v29 = vld [vmem:[%s4607_s30 + $0xe8] ss:$16 sps:$4 sm:$0xff]   ;;  %2118 = vmatpush1.bf16.msra.mxu1 %v3543_v6 }
 0x940   : > { %v3458_v8 = vpop.permute.xlu1 %3457 }
 0x941   : > { %v3460_v12 = vunpack.i.h.bf16 %v3458_v8  ;;  %v3459_v13 = vunpack.i.l.bf16 %v3458_v8 }
 0x943   : > { %v1731_v16 = vsel %vm1729_vm4, %v1728_v14, %v3460_v12  ;;  %v1730_v18 = vsel %vm1729_vm4, %v1727_v15, %v3459_v13 }
 0x944   : > { %v1732_v20 = vpack.c.bf16 %v1731_v16, %v1730_v18  ;;  %v3028_v16 = vld [vmem:[%s5225_s20] ss:$0 sm:$0xff]  ;;  %s3879_s20 = scalar_lea.vmem %s3878_s15, 512 }
 0x946   : > { %3271 = vmatmul.mubr.bf16.vlgmr.msra.gmra.mrb[12].mxu0 %v1732_v20 }
 0x947   : > { %2178 = vmatprep.mubr.bf16.mxu0 %v4041_v28  ;;  %2147 = vmatpush1.bf16.msra.mxu0 %v3504_v31  ;;  %v3554_v31 = vld [vmem:[%s4613_s25 + $0xc8] sm:$0xff]  }
 0x948   : > { %2148 = vmatprep.subr.bf16.mxu0 %v3512_v34  ;;  %v3557_v34 = vld [vmem:[%s4613_s25 + $0x50] sm:$0xff]  }
 0xa19   : > { %v1838_v2 = vpop.f32.mrb[12].mxu0 }
 0xa1a   : > { %v1839_v21 = vadd.f32 %v3019_v63, %v1838_v2  ;;  %v3272_v22 = vpop.f32.mrb[13].mxu0  ;;  %v3029_v2 = vld [vmem:[%s5227_s9] ss:$0 sm:$0xff] }
 0xa1b   : > { %v1841_v24 = vpop.f32.mrb[14].mxu0 }
 0xa1c   : > { %v1842_v17 = vadd.f32 %v3019_v63, %v1841_v24  ;;  %v3273_v25 = vpop.f32.mrb[15].mxu0  ;;  %v1845_v26 = vadd.f32 %v1839_v21, %v4696_v49  ;;  %v3510_v49 = vld [vmem:[%s4607_s30 + $0x28] ss:$16 sps:$4 sm:$0xff]  }
 0xa1d   : > { %2149 = vmatpush1.bf16.msra.mxu0 %v3510_v49  ;;  %v3549_v25 = vld [vmem:[%s4613_s25 + $0x40] sm:$0xff]   ;;  %v3559_v49 = vld [vmem:[%s4613_s25 + $0x10] sm:$0xff]  }
 0xa1e   : > { %1849 = vadd.xlane.f32.xlu0 %v1845_v26  ;;  %v1846_v28 = vadd.f32 %v1842_v17, %v4699_v50  ;;  %2150 = vmatprep.subr.bf16.mxu0 %v3518_v44  ;;  %v3569_v44 = vld [vmem:[%s4613_s25 + $0x68] sm:$0xff]  }
 0xa1f   : > { %3142 = vmatprep.subr.bf16.mxu1 %v3549_v25 }
 0xa20   : > { %1851 = vadd.xlane.f32.xlu1 %v1846_v28 }
 0xa21   : > { %2151 = vmatpush1.bf16.msra.mxu0 %v3516_v23  ;;  %v3571_v23 = vld [vmem:[%s4613_s25 + $0x28] sm:$0xff]  }
 0xa22   : > { %2152 = vmatprep.subr.bf16.mxu0 %v3524_v47  ;;  %v3573_v47 = vld [vmem:[%s4613_s25 + $0x70] sm:$0xff]  }
 0xa25   : > { %2153 = vmatpush1.bf16.msra.mxu0 %v3522_v51  ;;  %v3575_v51 = vld [vmem:[%s4613_s25 + $0x30] sm:$0xff]  }
 0xa26   : > { %2154 = vmatprep.subr.bf16.mxu0 %v3530_v53  ;;  %v3577_v53 = vld [vmem:[%s4613_s25 + $0x78] sm:$0xff]  }
 0xa29   : > { %2155 = vmatpush1.bf16.msra.mxu0 %v3528_v54  ;;  %v3579_v54 = vld [vmem:[%s4613_s25 + $0x38] sm:$0xff]  }
 0xa2a   : > { %2156 = vmatprep.subr.bf16.mxu0 %v3536_v58  ;;  %v1921_v58 = vld [vmem:[%s4645_s5] sm:$0xf] }
 0xa2b   : > { %v1934_v62 = vrot.slane %v1921_v58, %v982_v9  ;;  %v1938_v1 = vrot.slane %v1921_v58, %v1937_v60 }
 0xa2d   : > { %2157 = vmatpush1.bf16.msra.mxu0 %v3534_v61  ;;  %v1926_v61 = vrot.slane %v1921_v58, %v974_v57 }
 0xa2e   : > { %2158 = vmatprep.subr.bf16.mxu0 %v3542_v0  ;;  %v1930_v0 = vrot.slane %v1921_v58, %v978_v59 }
 0xa31   : > { %2159 = vmatpush1.bf16.msra.mxu0 %v3540_v3 }
 0xa32   : > { %2160 = vmatprep.subr.bf16.mxu0 %v3548_v5 }
 0xa35   : > { %2161 = vmatpush1.bf16.msra.mxu0 %v3546_v29 }
 0xaab   : > { %v1850_v50 = vpop.xlane.xlu0 %1849 }
 0xaac   : > { %v1854_v36 = vmul.f32 0.0078125, %v1850_v50  ;;  %v3560_v50 = vld [vmem:[%s4613_s25 + $0x90] sm:$0xff]  }
 0xaad   : > { %v1852_v37 = vpop.xlane.xlu1 %1851 }
 0xaae   : > { %v4853_v38 = vsub.f32 %v1845_v26, %v1854_v36  ;;  %v1855_v39 = vmul.f32 0.0078125, %v1852_v37  ;;  %v3550_v26 = vld [vmem:[%s4613_s25 + $0xc0] sm:$0xff]   ;;  %v3561_v36 = vld [vmem:[%s4613_s25 + $0x58] sm:$0xff]  }
 0xaaf   : > { %3164 = vmatprep.subr.bf16.mxu0 %v3550_v26  ;;  %v3562_v37 = vld [vmem:[%s4613_s25 + $0xd8] sm:$0xff]  }
 0xab0   : > { %v4855_v40 = vsub.f32 %v1846_v28, %v1855_v39  ;;  %v1858_v41 = vmul.f32 %v4853_v38, %v4853_v38  ;;  %v3551_v28 = vld [vmem:[%s4613_s25] sm:$0xff]   ;;  %v3564_v39 = vld [vmem:[%s4613_s25 + $0x98] sm:$0xff]  }
 0xab2   : > { %1860 = vadd.xlane.f32.xlu0 %v1858_v41  ;;  %v1859_v42 = vmul.f32 %v4855_v40, %v4855_v40  ;;  %v3566_v41 = vld [vmem:[%s4613_s25 + $0xe0] sm:$0xff]  }
 0xab6   : > { %1862 = vadd.xlane.f32.xlu0 %v1859_v42  ;;  %v3567_v42 = vld [vmem:[%s4613_s25 + $0x20] sm:$0xff]  }
 0xb3f   : > { %v1861_v7 = vpop.xlane.xlu0 %1860 }
 0xb40   : > { %v1864_v8 = vmul.f32 0.0078125, %v1861_v7 }
 0xb42   : > { %v1866_v10 = vadd.f32 1e-12, %v1864_v8 }
 0xb43   : > { %v1863_v11 = vpop.xlane.xlu0 %1862 }
 0xb44   : > { %3613 = vrsqrt.f32 %v1866_v10  ;;  %v1865_v12 = vmul.f32 0.0078125, %v1863_v11 }
 0xb46   : > { %v1867_v13 = vadd.f32 1e-12, %v1865_v12 }
 0xb48   : > { %3615 = vrsqrt.f32 %v1867_v13 }
 0xb4e   : > { %v3614_v14 = vpop.eup %3613 }
 0xb4f   : > { %v1870_v15 = vmul.f32 %v3614_v14, %v4853_v38  ;;  %v3563_v38 = vld [vmem:[%s4613_s25 + $0x18] sm:$0xff]  }
 0xb51   : > { %v1878_v63 = vmul.f32 %v3028_v16, %v1870_v15 }
 0xb52   : > { %v3616_v18 = vpop.eup %3615 }
 0xb53   : > { %v1871_v20 = vmul.f32 %v3616_v18, %v4855_v40  ;;  %v4897_v22 = vadd.f32 %v3029_v2, %v1878_v63  ;;  %v3565_v40 = vld [vmem:[%s4613_s25 + $0x60] sm:$0xff]  }
 0xb55   : > { %v1879_v21 = vmul.f32 %v3028_v16, %v1871_v20 }
 0xb57   : > { %v4899_v24 = vadd.f32 %v3029_v2, %v1879_v21 }
 0xb59   : > { %v1888_v17 = vpack.c.bf16 %v4899_v24, %v4897_v22 }
 0xb5b   : > { %2136 = vmatmul.mubr.bf16.vlgmr.msra.gmra.mrb[28].mxu1 %v1888_v17  ;;  %2179 = vmatmul.mubr.bf16.vlgmr.msra.gmra.mrb[16].mxu0 %v1888_v17 }
 0xb5c   : > { %3143 = vmatpush3.bf16.msra.mxu1 %v3551_v28  ;;  %3165 = vmatpush3.bf16.msra.mxu0 %v3552_v27 }
 0xb5d   : > { %3144 = vmatprep.subr.bf16.mxu1 %v3553_v30  ;;  %3166 = vmatprep.subr.bf16.mxu0 %v3554_v31 }
 0xb60   : > { %3145 = vmatpush3.bf16.msra.mxu1 %v3555_v32  ;;  %3167 = vmatpush3.bf16.msra.mxu0 %v3556_v33 }
 0xb61   : > { %3146 = vmatprep.subr.bf16.mxu1 %v3557_v34  ;;  %3168 = vmatprep.subr.bf16.mxu0 %v3558_v35 }
 0xb64   : > { %3147 = vmatpush3.bf16.msra.mxu1 %v3559_v49  ;;  %3169 = vmatpush3.bf16.msra.mxu0 %v3560_v50 }
 0xb65   : > { %3148 = vmatprep.subr.bf16.mxu1 %v3561_v36  ;;  %3170 = vmatprep.subr.bf16.mxu0 %v3562_v37 }
 0xb68   : > { %3149 = vmatpush3.bf16.msra.mxu1 %v3563_v38  ;;  %3171 = vmatpush3.bf16.msra.mxu0 %v3564_v39 }
 0xb69   : > { %3150 = vmatprep.subr.bf16.mxu1 %v3565_v40  ;;  %3172 = vmatprep.subr.bf16.mxu0 %v3566_v41 }
 0xb6c   : > { %3151 = vmatpush3.bf16.msra.mxu1 %v3567_v42  ;;  %3173 = vmatpush3.bf16.msra.mxu0 %v3568_v43 }
 0xb6d   : > { %3152 = vmatprep.subr.bf16.mxu1 %v3569_v44  ;;  %3174 = vmatprep.subr.bf16.mxu0 %v3570_v45 }
 0xb70   : > { %3153 = vmatpush3.bf16.msra.mxu1 %v3571_v23  ;;  %3175 = vmatpush3.bf16.msra.mxu0 %v3572_v46 }
 0xb71   : > { %3154 = vmatprep.subr.bf16.mxu1 %v3573_v47  ;;  %3176 = vmatprep.subr.bf16.mxu0 %v3574_v48 }
 0xb74   : > { %3155 = vmatpush3.bf16.msra.mxu1 %v3575_v51  ;;  %3177 = vmatpush3.bf16.msra.mxu0 %v3576_v52 }
 0xb75   : > { %3156 = vmatprep.subr.bf16.mxu1 %v3577_v53  ;;  %3178 = vmatprep.subr.bf16.mxu0 %v3578_v19 }
 0xb78   : > { %3157 = vmatpush3.bf16.msra.mxu1 %v3579_v54  ;;  %3179 = vmatpush3.bf16.msra.mxu0 %v3580_v55 }
 0xc2e   : > { %v2137_v3 = vpop.f32.mrb[28].mxu1  ;;  %v2180_v4 = vpop.f32.mrb[16].mxu0 }
 0xc2f   : > { %v4943_v5 = vadd.f32 %v2137_v3, %v1926_v61  ;;  %v4945_v6 = vadd.f32 %v2180_v4, %v1934_v62  ;;  %v2139_v29 = vpop.f32.mrb[29].mxu1  ;;  %v2182_v7 = vpop.f32.mrb[17].mxu0 }
 0xc30   : > { %v4947_v8 = vadd.f32 %v2139_v29, %v1930_v0  ;;  %v4949_v10 = vadd.f32 %v2182_v7, %v1938_v1  ;;  %v2141_v57 = vpop.f32.mrb[30].mxu1  ;;  %v2184_v11 = vpop.f32.mrb[18].mxu0 }
 0xc31   : > { %v2197_v9 = vmul.f32 0.044715, %v4943_v5  ;;  %v2199_v56 = vmul.f32 0.044715, %v4945_v6  ;;  %v2142_v59 = vadd.f32 %v2141_v57, %v1926_v61  ;;  %v2185_v12 = vadd.f32 %v2184_v11, %v1934_v62  ;;  %v2143_v13 = vpop.f32.mrb[31].mxu1  ;;  %v2186_v14 = vpop.f32.mrb[19].mxu0 }
 0xc32   : > { %v2198_v15 = vmul.f32 0.044715, %v4947_v8  ;;  %v2200_v16 = vmul.f32 0.044715, %v4949_v10  ;;  %v4955_v18 = vadd.f32 %v2143_v13, %v1930_v0  ;;  %v4957_v20 = vadd.f32 %v2186_v14, %v1938_v1 }
 0xc33   : > { %v2205_v63 = vmul.f32 %v2197_v9, %v4943_v5  ;;  %v2207_v2 = vmul.f32 %v2199_v56, %v4945_v6  ;;  %v2201_v21 = vmul.f32 0.044715, %v2142_v59  ;;  %v2203_v17 = vmul.f32 0.044715, %v2185_v12 }
 0xc34   : > { %v2206_v25 = vmul.f32 %v2198_v15, %v4947_v8  ;;  %v2208_v26 = vmul.f32 %v2200_v16, %v4949_v10  ;;  %v2202_v28 = vmul.f32 0.044715, %v4955_v18  ;;  %v2204_v27 = vmul.f32 0.044715, %v4957_v20 }
 0xc35   : > { %v2213_v30 = vmul.f32 %v2205_v63, %v4943_v5  ;;  %v2215_v31 = vmul.f32 %v2207_v2, %v4945_v6  ;;  %v2209_v32 = vmul.f32 %v2201_v21, %v2142_v59  ;;  %v2211_v33 = vmul.f32 %v2203_v17, %v2185_v12 }
 0xc36   : > { %v2214_v34 = vmul.f32 %v2206_v25, %v4947_v8  ;;  %v2216_v35 = vmul.f32 %v2208_v26, %v4949_v10  ;;  %v2210_v49 = vmul.f32 %v2202_v28, %v4955_v18  ;;  %v2212_v50 = vmul.f32 %v2204_v27, %v4957_v20 }
 0xc37   : > { %v2221_v36 = vadd.f32 %v2213_v30, %v4943_v5  ;;  %v2223_v37 = vadd.f32 %v2215_v31, %v4945_v6  ;;  %v2217_v38 = vmul.f32 %v2209_v32, %v2142_v59  ;;  %v2219_v39 = vmul.f32 %v2211_v33, %v2185_v12 }
 0xc38   : > { %v2218_v40 = vmul.f32 %v2210_v49, %v4955_v18  ;;  %v2220_v41 = vmul.f32 %v2212_v50, %v4957_v20  ;;  %v2222_v23 = vadd.f32 %v2214_v34, %v4947_v8  ;;  %v2224_v51 = vadd.f32 %v2216_v35, %v4949_v10 }
 0xc39   : > { %v2229_v42 = vmul.f32 0.7978846, %v2221_v36  ;;  %v2231_v43 = vmul.f32 0.7978846, %v2223_v37  ;;  %v2225_v44 = vadd.f32 %v2217_v38, %v2142_v59  ;;  %v2227_v45 = vadd.f32 %v2219_v39, %v2185_v12 }
 0xc3a   : > { %v2226_v46 = vadd.f32 %v2218_v40, %v4955_v18  ;;  %v2230_v52 = vmul.f32 0.7978846, %v2222_v23  ;;  %v2228_v19 = vadd.f32 %v2220_v41, %v4957_v20  ;;  %v2232_v54 = vmul.f32 0.7978846, %v2224_v51 }
 0xc3b   : > { %3617 = vtanh.f32 %v2229_v42  ;;  %v2233_v47 = vmul.f32 0.7978846, %v2225_v44  ;;  %v2235_v48 = vmul.f32 0.7978846, %v2227_v45  ;;  %v2189_v3 = vmul.f32 0.5, %v4943_v5 }
 0xc3c   : > { %3619 = vtanh.f32 %v2231_v43  ;;  %v2234_v53 = vmul.f32 0.7978846, %v2226_v46  ;;  %v2236_v55 = vmul.f32 0.7978846, %v2228_v19  ;;  %v2193_v4 = vmul.f32 0.5, %v2142_v59 }
 0xc3d   : > { %3621 = vtanh.f32 %v2233_v47  ;;  %v2191_v57 = vmul.f32 0.5, %v4945_v6  ;;  %v2195_v11 = vmul.f32 0.5, %v2185_v12  ;;  %v2190_v13 = vmul.f32 0.5, %v4947_v8 }
 0xc3e   : > { %3623 = vtanh.f32 %v2235_v48  ;;  %v2194_v2 = vmul.f32 0.5, %v4955_v18  ;;  %v2192_v59 = vmul.f32 0.5, %v4949_v10  ;;  %v2196_v26 = vmul.f32 0.5, %v4957_v20  ;;  %v3062_v10 = vld [vmem:[%s876_s19] ss:$0 sm:$0xff]  ;;  %s5229_s19 = sld [smem:[#allocation29_spill]] }
 0xc3f   : > { %3625 = vtanh.f32 %v2230_v52 }
 0xc40   : > { %3627 = vtanh.f32 %v2234_v53 }
 0xc41   : > { %3629 = vtanh.f32 %v2232_v54 }
 0xc42   : > { %3631 = vtanh.f32 %v2236_v55 }
 0xc44   : > { %s3107_s22 = sshll.u32 %s5229_s19, 8 }
 0xc45   : > { %v3618_v58 = vpop.eup %3617  ;;  %s5007_s30 = scalar_lea.hbm %s5234_s6, %s3107_s22 }
 0xc46   : > { %v3620_v60 = vpop.eup %3619  ;;  %v2245_v61 = vadd.f32 1.0, %v3618_v58 }
 0xc47   : > { %v3622_v62 = vpop.eup %3621  ;;  %v2247_v0 = vadd.f32 1.0, %v3620_v60 }
 0xc48   : > { %v3624_v1 = vpop.eup %3623  ;;  %v2249_v29 = vadd.f32 1.0, %v3622_v62  ;;  %v2253_v15 = vmul.f32 %v2245_v61, %v2189_v3  ;;  %v3095_v3 = vld [vmem:[%s879_s13] ss:$0 sm:$0xff]  ;;  %s5015_s13 = scalar_lea.sflag [#allocation4], %s5235_s14 }
 0xc49   : > { %v3626_v7 = vpop.eup %3625  ;;  %v2251_v9 = vadd.f32 1.0, %v3624_v1  ;;  %v2255_v17 = vmul.f32 %v2247_v0, %v2191_v57 }
 0xc4a   : > { %v3628_v56 = vpop.eup %3627  ;;  %v2246_v14 = vadd.f32 1.0, %v3626_v7  ;;  %v2257_v16 = vmul.f32 %v2249_v29, %v2193_v4  ;;  %v3096_v7 = vld [vmem:[%s882_s24] ss:$0 sm:$0xff]  ;;  %s3873_s24 = scalar_lea.vmem %s5009_s18, 256 }
 0xc4b   : > { %v3630_v63 = vpop.eup %3629  ;;  %v2250_v21 = vadd.f32 1.0, %v3628_v56  ;;  %v2259_v25 = vmul.f32 %v2251_v9, %v2195_v11  ;;  %p3874_p6 = scmp.ne.s32.totalorder %s5009_s18, %s3873_s24  ;;  %p3881_p11 = scmp.lt.s32.totalorder %s3879_s20, %s3873_s24 }
 0xc4c   : > { %v3632_v5 = vpop.eup %3631  ;;  %v2248_v6 = vadd.f32 1.0, %v3630_v63  ;;  %v2261_v12 = vpack.c.bf16 %v2257_v16, %v2253_v15  ;;  %v2254_v28 = vmul.f32 %v2246_v14, %v2190_v13 }
 0xc4d   : > { %v2258_v27 = vmul.f32 %v2250_v21, %v2194_v2  ;;  %v2252_v8 = vadd.f32 1.0, %v3632_v5  ;;  %v2263_v30 = vpack.c.bf16 %v2259_v25, %v2255_v17  ;;  %p3875_p0 = pnand %p3874_p6, %p5236_p4  ;;  %p3882_p7 = por %p3881_p11, %p3880_p10 }
 0xc4e   : > { %v2256_v32 = vmul.f32 %v2248_v6, %v2192_v59 }
 0xc4f   : > { %v2262_v31 = vpack.c.bf16 %v2258_v27, %v2254_v28  ;;  %v2260_v33 = vmul.f32 %v2252_v8, %v2196_v26  ;;  %p3876_p8 = pneg %p3875_p0 }
 0xc51   : > { %2560 = vmatprep.mubr.bf16.mxu1 %v2262_v31  ;;  %v2264_v18 = vpack.c.bf16 %v2260_v33, %v2256_v32  ;;  %p3883_p3 = pnand %p3882_p7, %p3876_p8 }
 0xc52   : > { %2561 = vmatmul.mubr.bf16.vlgmr.msra.gmra.mrb[32].mxu1 %v2261_v12 }
 0xc53   : > { %2601 = vmatprep.mubr.bf16.mxu0 %v2264_v18 }
 0xc54   : > { %2602 = vmatmul.mubr.bf16.vlgmr.msra.gmra.mrb[20].mxu0 %v2263_v30 }
 0xd25   : > { %v3158_v34 = vpop.f32.mrb[32].mxu1 }
 0xd26   : > { %v3159_v20 = vpop.f32.mrb[33].mxu1 }
 0xd27   : > { %v3180_v35 = vpop.f32.mrb[20].mxu0  ;;  %v3160_v49 = vadd.f32 %v3159_v20, %v3158_v34  ;;  %v3161_v50 = vpop.f32.mrb[34].mxu1 }
 0xd28   : > { %v3181_v36 = vpop.f32.mrb[21].mxu0  ;;  %v3162_v37 = vpop.f32.mrb[35].mxu1 }
 0xd29   : > { %v2563_v38 = vadd.f32 %v3160_v49, %v3062_v10  ;;  %v3182_v39 = vadd.f32 %v3181_v36, %v3180_v35  ;;  %v3183_v40 = vpop.f32.mrb[22].mxu0  ;;  %v3163_v41 = vadd.f32 %v3162_v37, %v3161_v50 }
 0xd2a   : > { %v3184_v42 = vpop.f32.mrb[23].mxu0 }
 0xd2b   : > { %v2604_v43 = vadd.f32 %v3182_v39, %v2563_v38  ;;  %v2566_v44 = vadd.f32 %v3163_v41, %v3062_v10  ;;  %v3185_v45 = vadd.f32 %v3184_v42, %v3183_v40 }
 0xd2d   : > { %v2607_v23 = vadd.f32 %v3185_v45, %v2566_v44  ;;  %v2610_v46 = vadd.f32 %v2604_v43, %v4897_v22 }
 0xd2f   : > { %2614 = vadd.xlane.f32.xlu0 %v2610_v46  ;;  %v2611_v47 = vadd.f32 %v2607_v23, %v4899_v24 }
 0xd31   : > { %2616 = vadd.xlane.f32.xlu1 %v2611_v47 }
 0xdbc   : > { %v2615_v48 = vpop.xlane.xlu0 %2614 }
 0xdbd   : > { %v2618_v51 = vmul.f32 0.0078125, %v2615_v48 }
 0xdbe   : > { %v2617_v52 = vpop.xlane.xlu1 %2616 }
 0xdbf   : > { %v2620_v53 = vsub.f32 %v2610_v46, %v2618_v51  ;;  %v2619_v19 = vmul.f32 0.0078125, %v2617_v52 }
 0xdc1   : > { %v2621_v54 = vsub.f32 %v2611_v47, %v2619_v19  ;;  %v2622_v55 = vmul.f32 %v2620_v53, %v2620_v53 }
 0xdc3   : > { %2624 = vadd.xlane.f32.xlu0 %v2622_v55  ;;  %v2623_v58 = vmul.f32 %v2621_v54, %v2621_v54 }
 0xdc5   : > { %2626 = vadd.xlane.f32.xlu1 %v2623_v58 }
 0xe50   : > { %v2625_v60 = vpop.xlane.xlu0 %2624 }
 0xe51   : > { %v2628_v22 = vmul.f32 0.0078125, %v2625_v60 }
 0xe52   : > { %v2627_v61 = vpop.xlane.xlu1 %2626 }
 0xe53   : > { %v2630_v62 = vadd.f32 1e-12, %v2628_v22  ;;  %v2629_v24 = vmul.f32 0.0078125, %v2627_v61 }
 0xe55   : > { %3633 = vrsqrt.f32 %v2630_v62  ;;  %v2631_v0 = vadd.f32 1e-12, %v2629_v24 }
 0xe57   : > { %3635 = vrsqrt.f32 %v2631_v0 }
 0xe5f   : > { %v3634_v1 = vpop.eup %3633 }
 0xe60   : > { %v2634_v4 = vmul.f32 %v3634_v1, %v2620_v53 }
 0xe61   : > { %v3636_v29 = vpop.eup %3635 }
 0xe62   : > { %v2642_v57 = vmul.f32 %v3095_v3, %v2634_v4  ;;  %v2635_v11 = vmul.f32 %v3636_v29, %v2621_v54 }
 0xe64   : > { %v2643_v9 = vmul.f32 %v3095_v3, %v2635_v11  ;;  %v2650_v56 = vadd.f32 %v3096_v7, %v2642_v57 }
 0xe66   : > { %v2651_v13 = vadd.f32 %v3096_v7, %v2643_v9  ;;  %2652 = vst [vmem:[%s4660_s3] sm:$0xff] %v2650_v56 }
 0xe68   : > { %2653 = vst [vmem:[%s4660_s3 + $0x8] sm:$0xff] %v2651_v13 }
 0xe69   : > { %3886 = shalt.err (!%p3883_p3)
}
 0xe6a   : > { %s3887_s3 = scalar_lea.hbm %s5007_s30, 256  ;;  %s3891_s7 = scalar_lea.hbm %s5234_s6, 512 }
 0xe6b   : > { %p3888_p9 = scmp.ne.s32.totalorder %s5007_s30, %s3887_s3  ;;  %p3892_p2 = scmp.lt.u32.totalorder %s5007_s30, %s5234_s6 }
 0xe6c   : > { %p3893_p1 = scmp.lt.u32.totalorder %s3891_s7, %s3887_s3  ;;  %p3895_p6 = scmp.lt.u32.totalorder %s3887_s3, %s5007_s30 }
 0xe6d   : > { %p3889_p5 = pnand %p3888_p9, %p5236_p4 }
 0xe6e   : > { %p3894_p13 = por %p3893_p1, %p3892_p2 }
 0xe6f   : > { %p3890_p12 = pneg %p3889_p5 }
 0xe70   : > { %p3896_p0 = por %p3895_p6, %p3894_p13 }
 0xe72   : > { %p3897_p8 = pnand %p3896_p0, %p3890_p12 }
 0xe74   : > { %3900 = shalt.err (!%p3897_p8)
}
 0xe75   : > { %s4048_s25 = smov 128   ;;  %s4049_s21 = smov 8  }
 0xe76   : > { %3298 = dma.vmem_to_hbm [thread:$0]  (%p5236_p4), %s5009_s18, 256, %s5007_s30, %s5015_s13, %s4048_s25, %s4048_s25, %s4049_s21  }
 0xe77 PF: > { %s5237_s19 = sld [smem:[#allocation25_spill]]  ;;  %s5238_s1 = sld [smem:[#allocation34_spill]] }
 0xe78   : > { %p3335_p10 = scmp.ge.s32.totalorder %s4023_s0, 2 }
 0xe7d   : > { %s2683_s16 = sand.u32 1, %s5237_s19   ;;  %p5239_p11 = scmp.ne.s32.totalorder %s5238_s1, 0 }
 0xe7e   : > { %s2684_s17 = scalar_lea.sflag [#allocation4], %s2683_s16 }
 0xe7f   : > { %p3327_p7 = pnand %p3335_p10, %p5239_p11 }
 0xe81   : > { %3978 = dma.done.wait (!%p3327_p7), %s2684_s17, 256  }
 0xe82   : > { %3980 = vsyncadd (!%p3327_p7), %s2684_s17, 4294967040  ;;  %s36_s0 = sadd.s32 1, %s4023_s0   ;;  %s5240_s21 = sld [smem:[#allocation24_spill]] }
 0xe83   : > { %p33_p3 = scmp.ge.s32.totalorder %s36_s0, 6   ;;  %s5241_s12 = sld [smem:[#allocation38_spill]] }
 0xe84   : > { %s5242_s24 = sld [smem:[#allocation26_spill]]  ;;  %s5243_s25 = sld [smem:[#allocation27_spill]] }
 0xe85   : > { %s5244_s26 = sld [smem:[#allocation39_spill]]  ;;  %s5245_s27 = sld [smem:[#allocation30_spill]] }
 0xe86   : > { %s5246_s28 = sld [smem:[#allocation31_spill]]  ;;  %s5247_s29 = sld [smem:[#allocation35_spill]] }
 0xe87   : > { %s5248_s30 = sld [smem:[#allocation37_spill]]  ;;  %s5249_s22 = smov %s3991_s23 }
 0xe88   :  { %35 = sbr.rel (!%p33_p3) target bundleno = 30 (0x1e), region = 222 }
 0xe89   : > { %s5250_s23 = smov %s5241_s12 }
 0xe8f   :  { %2689 = vsyncpa [#allocation3], 1 }
 0xe90   :  { %2691 = vsyncpa [#allocation3 + $0x1], 1 }
 0xe91   :  { %2692 = vsyncpa [#allocation6], 1 }
 0xe92   :  { %2694 = vsyncpa [#allocation6 + $0x1], 1 }
 0xe93   :  { %2695 = vsyncpa [#allocation9], 1 }
 0xe94   :  { %2696 = vsyncpa [#allocation4], 1 }
 0xe95   :  { %2698 = vsyncpa [#allocation4 + $0x1], 1 }

</bundles_post_ra>
